<compile_context>
chip_gen: v7x
topology: tpu7x:2x2x1
jax: 0.10.0
libtpu: 0.0.40
codegen_flags: <defaults>
</compile_context>

<pallas_src>
import jax
import jax.numpy as jnp
from jax.experimental import pallas as pl
from jax.experimental.pallas import tpu as pltpu

C1 = 16   # conv1 output channels
C2 = 32   # conv2 output channels
KH = KW = 3


def _make_trunk_kernel(H, W, K1):
    """Fused conv1->relu->pool1->conv2->relu->pool2 kernel for one image."""
    H2, W2 = H // 2, W // 2
    H4, W4 = H // 4, W // 4

    def kernel(x1_ref, w1_ref, b1_ref, w2_ref, b2_ref, o_ref,
               c1_ref, vp1_ref, x2_ref, im2_ref, c2_ref, vp2_ref):
        # ---- Stage 1: ONE fused MXU dot over the pre-built im2col ----------
        a1 = jnp.dot(x1_ref[0], w1_ref[...],
                     preferred_element_type=jnp.float32)          # (H*W, C1)
        r1 = jnp.maximum(a1 + b1_ref[...], 0.0)                   # bias + ReLU
        c1_ref[...] = r1.reshape(H2, 2, W, C1)                    # (i2, q, j, c)

        # ---- Pool1: vertical pair-max (leading-dim view), then horizontal --
        vp1_ref[...] = jnp.maximum(c1_ref[:, 0],
                                   c1_ref[:, 1]).reshape(H2 * W, C1)
        p1 = jnp.maximum(vp1_ref[pl.ds(0, H2 * W2, stride=2), :],
                         vp1_ref[pl.ds(1, H2 * W2, stride=2), :])  # (H2*W2, C1)

        # ---- Stage-2 input: zero only the 1-px halo, write pooled interior -
        zr = jnp.zeros((1, W2 + 2, C1), jnp.float32)
        zc = jnp.zeros((H2 + 2, 1, C1), jnp.float32)
        x2_ref[0:1] = zr
        x2_ref[H2 + 1:H2 + 2] = zr
        x2_ref[:, 0:1, :] = zc
        x2_ref[:, W2 + 1:W2 + 2, :] = zc
        x2_ref[1:1 + H2, 1:1 + W2, :] = p1.reshape(H2, W2, C1)

        # ---- Stage-2 im2col: 9 shifted taps -> one (H2*W2, 144) bf16 LHS ---
        # (cast to bf16 exactly once, while writing the im2col buffer)
        for t in range(KH * KW):
            di, dj = t // KW, t % KW
            tap = x2_ref[di:di + H2, dj:dj + W2, :].reshape(H2 * W2, C1)
            im2_ref[:, t * C1:(t + 1) * C1] = tap.astype(jnp.bfloat16)

        # ---- Stage 2: ONE fused MXU dot + bias + ReLU -----------------------
        a2 = jnp.dot(im2_ref[...], w2_ref[...],
                     preferred_element_type=jnp.float32)          # (H2*W2, C2)
        r2 = jnp.maximum(a2 + b2_ref[...], 0.0)
        c2_ref[...] = r2.reshape(H4, 2, W2, C2)

        # ---- Pool2 + single output store ------------------------------------
        vp2_ref[...] = jnp.maximum(c2_ref[:, 0],
                                   c2_ref[:, 1]).reshape(H4 * W2, C2)
        o_ref[0] = jnp.maximum(vp2_ref[pl.ds(0, H4 * W4, stride=2), :],
                               vp2_ref[pl.ds(1, H4 * W4, stride=2), :])

    return kernel


def init_params(key, c_in):
    """Deterministic synthetic weights (PyTorch Conv2d layout: OIHW)."""
    k1, k2, k3, k4 = jax.random.split(key, 4)
    w1 = jax.random.normal(k1, (C1, c_in, KH, KW), jnp.float32) * (1.0 / (KH * KW * c_in)) ** 0.5
    b1 = jax.random.normal(k2, (C1,), jnp.float32) * 0.01
    w2 = jax.random.normal(k3, (C2, C1, KH, KW), jnp.float32) * (1.0 / (KH * KW * C1)) ** 0.5
    b2 = jax.random.normal(k4, (C2,), jnp.float32) * 0.01
    return {"w1": w1, "b1": b1, "w2": w2, "b2": b2}


def _padded_bytes(shape, itemsize):
    """(8,128)-padded VMEM footprint of one buffer."""
    lead = 1
    for d in shape[:-2]:
        lead *= d
    sub = -(-shape[-2] // 8) * 8
    lane = -(-shape[-1] // 128) * 128
    return lead * sub * lane * itemsize


def feat_extractor_forward(params, x_nchw):
    """FeatExtractor.forward: fused feature trunk, returns NCHW feature map."""
    B, Cin, H, W = x_nchw.shape
    assert H % 4 == 0 and W % 16 == 0, "trunk needs H % 4 == 0 and W % 16 == 0"
    # TODO(synk): PyTorch MaxPool2d(2) floors odd spatial dims; odd sizes are
    # not handled here.
    K1 = KH * KW * Cin
    K2 = KH * KW * C1
    H2, W2, H4, W4 = H // 2, W // 2, H // 4, W // 4

    # ---- layout glue (cheap, once per call, plain XLA) ----------------------
    # Stage-1 im2col built wrapper-side: lane-dense (B, H*W, 9*Cin) bf16.
    x = jnp.transpose(x_nchw, (0, 2, 3, 1))                       # NCHW -> NHWC
    xp = jnp.pad(x, ((0, 0), (1, 1), (1, 1), (0, 0)))
    taps = [xp[:, di:di + H, dj:dj + W, :] for di in range(KH) for dj in range(KW)]
    x1 = jnp.concatenate(taps, axis=-1).reshape(B, H * W, K1).astype(jnp.bfloat16)

    # Conv weights OIHW -> (kh*kw*Cin, Cout) bf16, matching the im2col order.
    w1 = jnp.transpose(params["w1"], (2, 3, 1, 0)).reshape(K1, C1).astype(jnp.bfloat16)
    w2 = jnp.transpose(params["w2"], (2, 3, 1, 0)).reshape(K2, C2).astype(jnp.bfloat16)
    b1 = params["b1"].reshape(1, C1).astype(jnp.float32)
    b2 = params["b2"].reshape(1, C2).astype(jnp.float32)

    kernel = _make_trunk_kernel(H, W, K1)

    scratch_shapes = [
        pltpu.VMEM((H2, 2, W, C1), jnp.float32),        # conv1 + bias + relu
        pltpu.VMEM((H2 * W, C1), jnp.float32),          # vertically pooled s1
        pltpu.VMEM((H2 + 2, W2 + 2, C1), jnp.float32),  # pooled1 with zero halo
        pltpu.VMEM((H2 * W2, K2), jnp.bfloat16),        # stage-2 im2col LHS
        pltpu.VMEM((H4, 2, W2, C2), jnp.float32),       # conv2 + bias + relu
        pltpu.VMEM((H4 * W2, C2), jnp.float32),         # vertically pooled s2
    ]

    # VMEM budget: double-buffered pipeline blocks + single-buffered scratch.
    vmem_est = (
        2 * _padded_bytes((H * W, K1), 2)
        + 2 * (_padded_bytes((K1, C1), 2) + _padded_bytes((1, C1), 4)
               + _padded_bytes((K2, C2), 2) + _padded_bytes((1, C2), 4))
        + 2 * _padded_bytes((H4 * W4, C2), 4)
        + _padded_bytes((H2, 2, W, C1), 4)
        + _padded_bytes((H2 * W, C1), 4)
        + _padded_bytes((H2 + 2, W2 + 2, C1), 4)
        + _padded_bytes((H2 * W2, K2), 2)
        + _padded_bytes((H4, 2, W2, C2), 4)
        + _padded_bytes((H4 * W2, C2), 4)
    )
    vmem_limit = int(min(max(2 * vmem_est, 16 * 1024 * 1024), 96 * 1024 * 1024))

    flops = 2 * B * (H * W * K1 * C1 + H2 * W2 * K2 * C2)
    bytes_accessed = (x1.size * 2 + w1.size * 2 + w2.size * 2
                      + (b1.size + b2.size) * 4 + B * H4 * W4 * C2 * 4)

    out = pl.pallas_call(
        kernel,
        out_shape=jax.ShapeDtypeStruct((B, H4 * W4, C2), jnp.float32),
        grid_spec=pltpu.PrefetchScalarGridSpec(
            num_scalar_prefetch=0,
            grid=(B,),
            in_specs=[
                pl.BlockSpec((1, H * W, K1), lambda b: (b, 0, 0)),
                pl.BlockSpec((K1, C1), lambda b: (0, 0)),
                pl.BlockSpec((1, C1), lambda b: (0, 0)),
                pl.BlockSpec((K2, C2), lambda b: (0, 0)),
                pl.BlockSpec((1, C2), lambda b: (0, 0)),
            ],
            out_specs=pl.BlockSpec((1, H4 * W4, C2), lambda b: (b, 0, 0)),
            scratch_shapes=scratch_shapes,
        ),
        compiler_params=pltpu.CompilerParams(
            dimension_semantics=("parallel",),
            vmem_limit_bytes=vmem_limit,
        ),
        cost_estimate=pl.CostEstimate(flops=flops, transcendentals=0,
                                      bytes_accessed=bytes_accessed),
    )(x1, w1, b1, w2, b2)

    out = out.reshape(B, H4, W4, C2)                              # NHWC layout
    return jnp.transpose(out, (0, 3, 1, 2))                       # -> NCHW
# TODO(synk): the real module selects among many pretrained backbones (ResNet/
# VGG/ViT/...); only a synthetic conv-relu-pool "features" trunk is reproduced.


def _reference_forward(params, x_nchw):
    """Pure-JAX f32 reference for a numerical sanity check."""
    dn = ("NCHW", "OIHW", "NCHW")
    hi = jax.lax.Precision.HIGHEST
    y = jax.lax.conv_general_dilated(x_nchw, params["w1"], (1, 1), "SAME",
                                     dimension_numbers=dn, precision=hi)
    y = jax.nn.relu(y + params["b1"][None, :, None, None])
    y = jax.lax.reduce_window(y, -jnp.inf, jax.lax.max,
                              (1, 1, 2, 2), (1, 1, 2, 2), "VALID")
    y = jax.lax.conv_general_dilated(y, params["w2"], (1, 1), "SAME",
                                     dimension_numbers=dn, precision=hi)
    y = jax.nn.relu(y + params["b2"][None, :, None, None])
    y = jax.lax.reduce_window(y, -jnp.inf, jax.lax.max,
                              (1, 1, 2, 2), (1, 1, 2, 2), "VALID")
    return y


if __name__ == "__main__":
    key = jax.random.PRNGKey(0)
    k_x, k_p = jax.random.split(key)

    B, Cin, H, W = 2, 4, 16, 16
    x = jax.random.normal(k_x, (B, Cin, H, W), jnp.float32)
    params = init_params(k_p, Cin)

    fwd = jax.jit(feat_extractor_forward)
    out = jax.block_until_ready(fwd(params, x))

    assert out.shape == (B, C2, H // 4, W // 4), out.shape
    assert out.dtype == jnp.float32

    ref = jax.block_until_ready(_reference_forward(params, x))
    max_err = float(jnp.max(jnp.abs(out - ref)))
    assert max_err < 0.1, f"numerical mismatch vs reference: {max_err}"

    print("KERNEL_OK")
</pallas_src>

<mosaic_0001>
module attributes {stable_mosaic.version = 11 : i64} {
  func.func @kernel(%arg0: i32, %arg1: memref<1x256x36xbf16, #tpu.memory_space<vmem>>, %arg2: memref<36x16xbf16, #tpu.memory_space<vmem>>, %arg3: memref<1x16xf32, #tpu.memory_space<vmem>>, %arg4: memref<144x32xbf16, #tpu.memory_space<vmem>>, %arg5: memref<1x32xf32, #tpu.memory_space<vmem>>, %arg6: memref<1x16x32xf32, #tpu.memory_space<vmem>>, %arg7: memref<8x2x16x16xf32, #tpu.memory_space<vmem>>, %arg8: memref<128x16xf32, #tpu.memory_space<vmem>>, %arg9: memref<10x10x16xf32, #tpu.memory_space<vmem>>, %arg10: memref<64x144xbf16, #tpu.memory_space<vmem>>, %arg11: memref<4x2x8x32xf32, #tpu.memory_space<vmem>>, %arg12: memref<32x32xf32, #tpu.memory_space<vmem>>) attributes {dimension_semantics = [#tpu.dimension_semantics<parallel>], iteration_bounds = array<i64: 2>, scalar_prefetch = 0 : i64, scratch_operands = 6 : i64, tpu.core_type = #tpu.core_type<tc>, window_params = [{transform_indices = @transform_0, window_bounds = array<i64: 1, 256, 36>}, {pipeline_mode = #tpu.pipeline_mode<synchronous>, transform_indices = @transform_1, window_bounds = array<i64: 36, 16>}, {pipeline_mode = #tpu.pipeline_mode<synchronous>, transform_indices = @transform_2, window_bounds = array<i64: 1, 16>}, {pipeline_mode = #tpu.pipeline_mode<synchronous>, transform_indices = @transform_3, window_bounds = array<i64: 144, 32>}, {pipeline_mode = #tpu.pipeline_mode<synchronous>, transform_indices = @transform_4, window_bounds = array<i64: 1, 32>}, {transform_indices = @transform_5, window_bounds = array<i64: 1, 16, 32>}]} {
    %c0 = arith.constant 0 : index
    %c0_0 = arith.constant 0 : index
    %c0_1 = arith.constant 0 : index
    %0 = vector.load %arg1[%c0, %c0_0, %c0_1] : memref<1x256x36xbf16, #tpu.memory_space<vmem>>, vector<1x256x36xbf16>
    %1 = vector.shape_cast %0 : vector<1x256x36xbf16> to vector<256x36xbf16>
    %c0_2 = arith.constant 0 : index
    %c0_3 = arith.constant 0 : index
    %2 = vector.load %arg2[%c0_2, %c0_3] : memref<36x16xbf16, #tpu.memory_space<vmem>>, vector<36x16xbf16>
    %cst = arith.constant dense<0.000000e+00> : vector<256x16xf32>
    %3 = tpu.matmul %1, %2, %cst {dimension_numbers = #tpu.dot_dimension_numbers<[1], [0], [0], [1], [0, 0, 1, 1], [], []>} : vector<256x36xbf16>, vector<36x16xbf16>, vector<256x16xf32> -> vector<256x16xf32>
    %c0_4 = arith.constant 0 : index
    %c0_5 = arith.constant 0 : index
    %4 = vector.load %arg3[%c0_4, %c0_5] : memref<1x16xf32, #tpu.memory_space<vmem>>, vector<1x16xf32>
    %5 = vector.broadcast %4 : vector<1x16xf32> to vector<256x16xf32>
    %6 = arith.addf %3, %5 : vector<256x16xf32>
    %cst_6 = arith.constant 0.000000e+00 : f32
    %7 = vector.broadcast %cst_6 : f32 to vector<256x16xf32>
    %8 = arith.maximumf %6, %7 : vector<256x16xf32>
    %9 = vector.shape_cast %8 : vector<256x16xf32> to vector<8x2x16x16xf32>
    %c0_7 = arith.constant 0 : index
    %c0_8 = arith.constant 0 : index
    %c0_9 = arith.constant 0 : index
    %c0_10 = arith.constant 0 : index
    %10 = vector.load %arg7[%c0_7, %c0_8, %c0_9, %c0_10] : memref<8x2x16x16xf32, #tpu.memory_space<vmem>>, vector<8x2x16x16xf32>
    tpu.vector_store %arg7[%c0_7, %c0_8, %c0_9, %c0_10], %9 {strides = array<i32>} : memref<8x2x16x16xf32, #tpu.memory_space<vmem>>, vector<8x2x16x16xf32>,
    %c0_11 = arith.constant 0 : index
    %c0_12 = arith.constant 0 : index
    %c0_13 = arith.constant 0 : index
    %c0_14 = arith.constant 0 : index
    %11 = vector.load %arg7[%c0_11, %c0_12, %c0_13, %c0_14] : memref<8x2x16x16xf32, #tpu.memory_space<vmem>>, vector<8x1x16x16xf32>
    %12 = vector.shape_cast %11 : vector<8x1x16x16xf32> to vector<8x16x16xf32>
    %c0_15 = arith.constant 0 : index
    %c1 = arith.constant 1 : index
    %c0_16 = arith.constant 0 : index
    %c0_17 = arith.constant 0 : index
    %13 = vector.load %arg7[%c0_15, %c1, %c0_16, %c0_17] : memref<8x2x16x16xf32, #tpu.memory_space<vmem>>, vector<8x1x16x16xf32>
    %14 = vector.shape_cast %13 : vector<8x1x16x16xf32> to vector<8x16x16xf32>
    %15 = arith.maximumf %12, %14 : vector<8x16x16xf32>
    %16 = vector.shape_cast %15 : vector<8x16x16xf32> to vector<128x16xf32>
    %c0_18 = arith.constant 0 : index
    %c0_19 = arith.constant 0 : index
    %17 = vector.load %arg8[%c0_18, %c0_19] : memref<128x16xf32, #tpu.memory_space<vmem>>, vector<128x16xf32>
    tpu.vector_store %arg8[%c0_18, %c0_19], %16 {strides = array<i32>} : memref<128x16xf32, #tpu.memory_space<vmem>>, vector<128x16xf32>,
    %c0_20 = arith.constant 0 : index
    %c0_21 = arith.constant 0 : index
    %18 = tpu.strided_load %arg8[%c0_20, %c0_21] {strides = array<i32: 2, 1>} : memref<128x16xf32, #tpu.memory_space<vmem>>, vector<64x16xf32>
    %c1_22 = arith.constant 1 : index
    %c0_23 = arith.constant 0 : index
    %19 = tpu.strided_load %arg8[%c1_22, %c0_23] {strides = array<i32: 2, 1>} : memref<128x16xf32, #tpu.memory_space<vmem>>, vector<64x16xf32>
    %20 = arith.maximumf %18, %19 : vector<64x16xf32>
    %cst_24 = arith.constant 0.000000e+00 : f32
    %21 = vector.broadcast %cst_24 : f32 to vector<1x10x16xf32>
    %cst_25 = arith.constant 0.000000e+00 : f32
    %22 = vector.broadcast %cst_25 : f32 to vector<10x1x16xf32>
    %c0_26 = arith.constant 0 : index
    %c0_27 = arith.constant 0 : index
    %c0_28 = arith.constant 0 : index
    %23 = vector.load %arg9[%c0_26, %c0_27, %c0_28] : memref<10x10x16xf32, #tpu.memory_space<vmem>>, vector<1x10x16xf32>
    tpu.vector_store %arg9[%c0_26, %c0_27, %c0_28], %21 {strides = array<i32>} : memref<10x10x16xf32, #tpu.memory_space<vmem>>, vector<1x10x16xf32>,
    %c9 = arith.constant 9 : index
    %c0_29 = arith.constant 0 : index
    %c0_30 = arith.constant 0 : index
    %24 = vector.load %arg9[%c9, %c0_29, %c0_30] : memref<10x10x16xf32, #tpu.memory_space<vmem>>, vector<1x10x16xf32>
    tpu.vector_store %arg9[%c9, %c0_29, %c0_30], %21 {strides = array<i32>} : memref<10x10x16xf32, #tpu.memory_space<vmem>>, vector<1x10x16xf32>,
    %c0_31 = arith.constant 0 : index
    %c0_32 = arith.constant 0 : index
    %c0_33 = arith.constant 0 : index
    %25 = vector.load %arg9[%c0_31, %c0_32, %c0_33] : memref<10x10x16xf32, #tpu.memory_space<vmem>>, vector<10x1x16xf32>
    tpu.vector_store %arg9[%c0_31, %c0_32, %c0_33], %22 {strides = array<i32>} : memref<10x10x16xf32, #tpu.memory_space<vmem>>, vector<10x1x16xf32>,
    %c0_34 = arith.constant 0 : index
    %c9_35 = arith.constant 9 : index
    %c0_36 = arith.constant 0 : index
    %26 = vector.load %arg9[%c0_34, %c9_35, %c0_36] : memref<10x10x16xf32, #tpu.memory_space<vmem>>, vector<10x1x16xf32>
    tpu.vector_store %arg9[%c0_34, %c9_35, %c0_36], %22 {strides = array<i32>} : memref<10x10x16xf32, #tpu.memory_space<vmem>>, vector<10x1x16xf32>,
    %27 = vector.shape_cast %20 : vector<64x16xf32> to vector<8x8x16xf32>
    %c1_37 = arith.constant 1 : index
    %c1_38 = arith.constant 1 : index
    %c0_39 = arith.constant 0 : index
    %28 = vector.load %arg9[%c1_37, %c1_38, %c0_39] : memref<10x10x16xf32, #tpu.memory_space<vmem>>, vector<8x8x16xf32>
    tpu.vector_store %arg9[%c1_37, %c1_38, %c0_39], %27 {strides = array<i32>} : memref<10x10x16xf32, #tpu.memory_space<vmem>>, vector<8x8x16xf32>,
    %c0_40 = arith.constant 0 : index
    %c0_41 = arith.constant 0 : index
    %c0_42 = arith.constant 0 : index
    %29 = vector.load %arg9[%c0_40, %c0_41, %c0_42] : memref<10x10x16xf32, #tpu.memory_space<vmem>>, vector<8x8x16xf32>
    %30 = vector.shape_cast %29 : vector<8x8x16xf32> to vector<64x16xf32>
    %31 = arith.truncf %30 : vector<64x16xf32> to vector<64x16xbf16>
    %c0_43 = arith.constant 0 : index
    %c0_44 = arith.constant 0 : index
    %32 = vector.load %arg10[%c0_43, %c0_44] : memref<64x144xbf16, #tpu.memory_space<vmem>>, vector<64x16xbf16>
    tpu.vector_store %arg10[%c0_43, %c0_44], %31 {strides = array<i32>} : memref<64x144xbf16, #tpu.memory_space<vmem>>, vector<64x16xbf16>,
    %c0_45 = arith.constant 0 : index
    %c1_46 = arith.constant 1 : index
    %c0_47 = arith.constant 0 : index
    %33 = vector.load %arg9[%c0_45, %c1_46, %c0_47] : memref<10x10x16xf32, #tpu.memory_space<vmem>>, vector<8x8x16xf32>
    %34 = vector.shape_cast %33 : vector<8x8x16xf32> to vector<64x16xf32>
    %35 = arith.truncf %34 : vector<64x16xf32> to vector<64x16xbf16>
    %c0_48 = arith.constant 0 : index
    %c16 = arith.constant 16 : index
    %36 = vector.load %arg10[%c0_48, %c16] : memref<64x144xbf16, #tpu.memory_space<vmem>>, vector<64x16xbf16>
    tpu.vector_store %arg10[%c0_48, %c16], %35 {strides = array<i32>} : memref<64x144xbf16, #tpu.memory_space<vmem>>, vector<64x16xbf16>,
    %c0_49 = arith.constant 0 : index
    %c2 = arith.constant 2 : index
    %c0_50 = arith.constant 0 : index
    %37 = vector.load %arg9[%c0_49, %c2, %c0_50] : memref<10x10x16xf32, #tpu.memory_space<vmem>>, vector<8x8x16xf32>
    %38 = vector.shape_cast %37 : vector<8x8x16xf32> to vector<64x16xf32>
    %39 = arith.truncf %38 : vector<64x16xf32> to vector<64x16xbf16>
    %c0_51 = arith.constant 0 : index
    %c32 = arith.constant 32 : index
    %40 = vector.load %arg10[%c0_51, %c32] : memref<64x144xbf16, #tpu.memory_space<vmem>>, vector<64x16xbf16>
    tpu.vector_store %arg10[%c0_51, %c32], %39 {strides = array<i32>} : memref<64x144xbf16, #tpu.memory_space<vmem>>, vector<64x16xbf16>,
    %c1_52 = arith.constant 1 : index
    %c0_53 = arith.constant 0 : index
    %c0_54 = arith.constant 0 : index
    %41 = vector.load %arg9[%c1_52, %c0_53, %c0_54] : memref<10x10x16xf32, #tpu.memory_space<vmem>>, vector<8x8x16xf32>
    %42 = vector.shape_cast %41 : vector<8x8x16xf32> to vector<64x16xf32>
    %43 = arith.truncf %42 : vector<64x16xf32> to vector<64x16xbf16>
    %c0_55 = arith.constant 0 : index
    %c48 = arith.constant 48 : index
    %44 = vector.load %arg10[%c0_55, %c48] : memref<64x144xbf16, #tpu.memory_space<vmem>>, vector<64x16xbf16>
    tpu.vector_store %arg10[%c0_55, %c48], %43 {strides = array<i32>} : memref<64x144xbf16, #tpu.memory_space<vmem>>, vector<64x16xbf16>,
    %c1_56 = arith.constant 1 : index
    %c1_57 = arith.constant 1 : index
    %c0_58 = arith.constant 0 : index
    %45 = vector.load %arg9[%c1_56, %c1_57, %c0_58] : memref<10x10x16xf32, #tpu.memory_space<vmem>>, vector<8x8x16xf32>
    %46 = vector.shape_cast %45 : vector<8x8x16xf32> to vector<64x16xf32>
    %47 = arith.truncf %46 : vector<64x16xf32> to vector<64x16xbf16>
    %c0_59 = arith.constant 0 : index
    %c64 = arith.constant 64 : index
    %48 = vector.load %arg10[%c0_59, %c64] : memref<64x144xbf16, #tpu.memory_space<vmem>>, vector<64x16xbf16>
    tpu.vector_store %arg10[%c0_59, %c64], %47 {strides = array<i32>} : memref<64x144xbf16, #tpu.memory_space<vmem>>, vector<64x16xbf16>,
    %c1_60 = arith.constant 1 : index
    %c2_61 = arith.constant 2 : index
    %c0_62 = arith.constant 0 : index
    %49 = vector.load %arg9[%c1_60, %c2_61, %c0_62] : memref<10x10x16xf32, #tpu.memory_space<vmem>>, vector<8x8x16xf32>
    %50 = vector.shape_cast %49 : vector<8x8x16xf32> to vector<64x16xf32>
    %51 = arith.truncf %50 : vector<64x16xf32> to vector<64x16xbf16>
    %c0_63 = arith.constant 0 : index
    %c80 = arith.constant 80 : index
    %52 = vector.load %arg10[%c0_63, %c80] : memref<64x144xbf16, #tpu.memory_space<vmem>>, vector<64x16xbf16>
    tpu.vector_store %arg10[%c0_63, %c80], %51 {strides = array<i32>} : memref<64x144xbf16, #tpu.memory_space<vmem>>, vector<64x16xbf16>,
    %c2_64 = arith.constant 2 : index
    %c0_65 = arith.constant 0 : index
    %c0_66 = arith.constant 0 : index
    %53 = vector.load %arg9[%c2_64, %c0_65, %c0_66] : memref<10x10x16xf32, #tpu.memory_space<vmem>>, vector<8x8x16xf32>
    %54 = vector.shape_cast %53 : vector<8x8x16xf32> to vector<64x16xf32>
    %55 = arith.truncf %54 : vector<64x16xf32> to vector<64x16xbf16>
    %c0_67 = arith.constant 0 : index
    %c96 = arith.constant 96 : index
    %56 = vector.load %arg10[%c0_67, %c96] : memref<64x144xbf16, #tpu.memory_space<vmem>>, vector<64x16xbf16>
    tpu.vector_store %arg10[%c0_67, %c96], %55 {strides = array<i32>} : memref<64x144xbf16, #tpu.memory_space<vmem>>, vector<64x16xbf16>,
    %c2_68 = arith.constant 2 : index
    %c1_69 = arith.constant 1 : index
    %c0_70 = arith.constant 0 : index
    %57 = vector.load %arg9[%c2_68, %c1_69, %c0_70] : memref<10x10x16xf32, #tpu.memory_space<vmem>>, vector<8x8x16xf32>
    %58 = vector.shape_cast %57 : vector<8x8x16xf32> to vector<64x16xf32>
    %59 = arith.truncf %58 : vector<64x16xf32> to vector<64x16xbf16>
    %c0_71 = arith.constant 0 : index
    %c112 = arith.constant 112 : index
    %60 = vector.load %arg10[%c0_71, %c112] : memref<64x144xbf16, #tpu.memory_space<vmem>>, vector<64x16xbf16>
    tpu.vector_store %arg10[%c0_71, %c112], %59 {strides = array<i32>} : memref<64x144xbf16, #tpu.memory_space<vmem>>, vector<64x16xbf16>,
    %c2_72 = arith.constant 2 : index
    %c2_73 = arith.constant 2 : index
    %c0_74 = arith.constant 0 : index
    %61 = vector.load %arg9[%c2_72, %c2_73, %c0_74] : memref<10x10x16xf32, #tpu.memory_space<vmem>>, vector<8x8x16xf32>
    %62 = vector.shape_cast %61 : vector<8x8x16xf32> to vector<64x16xf32>
    %63 = arith.truncf %62 : vector<64x16xf32> to vector<64x16xbf16>
    %c0_75 = arith.constant 0 : index
    %c128 = arith.constant 128 : index
    %64 = vector.load %arg10[%c0_75, %c128] : memref<64x144xbf16, #tpu.memory_space<vmem>>, vector<64x16xbf16>
    tpu.vector_store %arg10[%c0_75, %c128], %63 {strides = array<i32>} : memref<64x144xbf16, #tpu.memory_space<vmem>>, vector<64x16xbf16>,
    %c0_76 = arith.constant 0 : index
    %c0_77 = arith.constant 0 : index
    %65 = vector.load %arg10[%c0_76, %c0_77] : memref<64x144xbf16, #tpu.memory_space<vmem>>, vector<64x144xbf16>
    %c0_78 = arith.constant 0 : index
    %c0_79 = arith.constant 0 : index
    %66 = vector.load %arg4[%c0_78, %c0_79] : memref<144x32xbf16, #tpu.memory_space<vmem>>, vector<144x32xbf16>
    %cst_80 = arith.constant dense<0.000000e+00> : vector<64x32xf32>
    %67 = tpu.matmul %65, %66, %cst_80 {dimension_numbers = #tpu.dot_dimension_numbers<[1], [0], [0], [1], [0, 0, 1, 1], [], []>} : vector<64x144xbf16>, vector<144x32xbf16>, vector<64x32xf32> -> vector<64x32xf32>
    %c0_81 = arith.constant 0 : index
    %c0_82 = arith.constant 0 : index
    %68 = vector.load %arg5[%c0_81, %c0_82] : memref<1x32xf32, #tpu.memory_space<vmem>>, vector<1x32xf32>
    %69 = vector.broadcast %68 : vector<1x32xf32> to vector<64x32xf32>
    %70 = arith.addf %67, %69 : vector<64x32xf32>
    %cst_83 = arith.constant 0.000000e+00 : f32
    %71 = vector.broadcast %cst_83 : f32 to vector<64x32xf32>
    %72 = arith.maximumf %70, %71 : vector<64x32xf32>
    %73 = vector.shape_cast %72 : vector<64x32xf32> to vector<4x2x8x32xf32>
    %c0_84 = arith.constant 0 : index
    %c0_85 = arith.constant 0 : index
    %c0_86 = arith.constant 0 : index
    %c0_87 = arith.constant 0 : index
    %74 = vector.load %arg11[%c0_84, %c0_85, %c0_86, %c0_87] : memref<4x2x8x32xf32, #tpu.memory_space<vmem>>, vector<4x2x8x32xf32>
    tpu.vector_store %arg11[%c0_84, %c0_85, %c0_86, %c0_87], %73 {strides = array<i32>} : memref<4x2x8x32xf32, #tpu.memory_space<vmem>>, vector<4x2x8x32xf32>,
    %c0_88 = arith.constant 0 : index
    %c0_89 = arith.constant 0 : index
    %c0_90 = arith.constant 0 : index
    %c0_91 = arith.constant 0 : index
    %75 = vector.load %arg11[%c0_88, %c0_89, %c0_90, %c0_91] : memref<4x2x8x32xf32, #tpu.memory_space<vmem>>, vector<4x1x8x32xf32>
    %76 = vector.shape_cast %75 : vector<4x1x8x32xf32> to vector<4x8x32xf32>
    %c0_92 = arith.constant 0 : index
    %c1_93 = arith.constant 1 : index
    %c0_94 = arith.constant 0 : index
    %c0_95 = arith.constant 0 : index
    %77 = vector.load %arg11[%c0_92, %c1_93, %c0_94, %c0_95] : memref<4x2x8x32xf32, #tpu.memory_space<vmem>>, vector<4x1x8x32xf32>
    %78 = vector.shape_cast %77 : vector<4x1x8x32xf32> to vector<4x8x32xf32>
    %79 = arith.maximumf %76, %78 : vector<4x8x32xf32>
    %80 = vector.shape_cast %79 : vector<4x8x32xf32> to vector<32x32xf32>
    %c0_96 = arith.constant 0 : index
    %c0_97 = arith.constant 0 : index
    %81 = vector.load %arg12[%c0_96, %c0_97] : memref<32x32xf32, #tpu.memory_space<vmem>>, vector<32x32xf32>
    tpu.vector_store %arg12[%c0_96, %c0_97], %80 {strides = array<i32>} : memref<32x32xf32, #tpu.memory_space<vmem>>, vector<32x32xf32>,
    %c0_98 = arith.constant 0 : index
    %c0_99 = arith.constant 0 : index
    %82 = tpu.strided_load %arg12[%c0_98, %c0_99] {strides = array<i32: 2, 1>} : memref<32x32xf32, #tpu.memory_space<vmem>>, vector<16x32xf32>
    %c1_100 = arith.constant 1 : index
    %c0_101 = arith.constant 0 : index
    %83 = tpu.strided_load %arg12[%c1_100, %c0_101] {strides = array<i32: 2, 1>} : memref<32x32xf32, #tpu.memory_space<vmem>>, vector<16x32xf32>
    %84 = arith.maximumf %82, %83 : vector<16x32xf32>
    %c0_102 = arith.constant 0 : index
    %c0_103 = arith.constant 0 : index
    %c0_104 = arith.constant 0 : index
    %85 = vector.load %arg6[%c0_102, %c0_103, %c0_104] : memref<1x16x32xf32, #tpu.memory_space<vmem>>, vector<1x16x32xf32>
    %86 = vector.shape_cast %85 : vector<1x16x32xf32> to vector<16x32xf32>
    %87 = vector.shape_cast %84 : vector<16x32xf32> to vector<1x16x32xf32>
    tpu.vector_store %arg6[%c0_102, %c0_103, %c0_104], %87 {strides = array<i32>} : memref<1x16x32xf32, #tpu.memory_space<vmem>>, vector<1x16x32xf32>,
    return
  }
  func.func @transform_0(%arg0: i32) -> (i32, i32, i32) {
    %c0_i32 = arith.constant 0 : i32
    %c0_i32_0 = arith.constant 0 : i32
    %c0_i32_1 = arith.constant 0 : i32
    return %arg0, %c0_i32, %c0_i32_0 : i32, i32, i32
  }
  func.func @transform_1(%arg0: i32) -> (i32, i32) {
    %c0_i32 = arith.constant 0 : i32
    %c0_i32_0 = arith.constant 0 : i32
    %c0_i32_1 = arith.constant 0 : i32
    return %c0_i32, %c0_i32_0 : i32, i32
  }
  func.func @transform_2(%arg0: i32) -> (i32, i32) {
    %c0_i32 = arith.constant 0 : i32
    %c0_i32_0 = arith.constant 0 : i32
    %c0_i32_1 = arith.constant 0 : i32
    return %c0_i32, %c0_i32_0 : i32, i32
  }
  func.func @transform_3(%arg0: i32) -> (i32, i32) {
    %c0_i32 = arith.constant 0 : i32
    %c0_i32_0 = arith.constant 0 : i32
    %c0_i32_1 = arith.constant 0 : i32
    return %c0_i32, %c0_i32_0 : i32, i32
  }
  func.func @transform_4(%arg0: i32) -> (i32, i32) {
    %c0_i32 = arith.constant 0 : i32
    %c0_i32_0 = arith.constant 0 : i32
    %c0_i32_1 = arith.constant 0 : i32
    return %c0_i32, %c0_i32_0 : i32, i32
  }
  func.func @transform_5(%arg0: i32) -> (i32, i32, i32) {
    %c0_i32 = arith.constant 0 : i32
    %c0_i32_0 = arith.constant 0 : i32
    %c0_i32_1 = arith.constant 0 : i32
    return %arg0, %c0_i32, %c0_i32_0 : i32, i32, i32
  }
}

</mosaic_0001>

<bundles_post_ra>
// kernel: feat_extractor_forward.1
= control target key start
LH: loop header
LB: loop body
LE: loop exit
PB: predicated region body
PF: predicated region fallthrough
CT: control target
= control target key end

     0   :  { %10 = vsyncpa [#allocation9], 0  ;;  %s2035_s0 = inlined_call_operand.vmem [shape: bf16[2,256,36], index: 0, kind: input, shape index: {}]   ;;  %s2036_s1 = inlined_call_operand.vmem [shape: bf16[36,16], index: 1, kind: input, shape index: {}]   ;;  %s2037_s2 = inlined_call_operand.vmem [shape: f32[1,16], index: 2, kind: input, shape index: {}]   ;;  %s2038_s3 = inlined_call_operand.vmem [shape: bf16[144,32], index: 3, kind: input, shape index: {}]   ;;  %s2039_s4 = inlined_call_operand.vmem [shape: f32[1,32], index: 4, kind: input, shape index: {}]   ;;  %s2040_s5 = inlined_call_operand.hbm [shape: f32[2,16,32], index: 5, kind: output, shape index: {}]  }
   0x1   :  { %12 = vsyncpa [#allocation9 + $0x1], 0  ;;  %s1637_s18 = smov 0   ;;  %s1639_s19 = smov 0  }
   0x2   :  { %s1641_s20 = smov 0   ;;  %s1643_s21 = smov 0  }
   0x3 LB: > { %s1658_s22 = sadd.s32 4294967295, %s1593_s21   ;;  %s1331_s23 = sadd.s32 4294967294, %s1593_s21   ;;  %s1593_s21 = sphi %s1643_s21, %s2046_s21   ;;  %s1589_s20 = sphi %s1641_s20, %s2045_s20   ;;  %s1585_s19 = sphi %s1639_s19, %s2044_s19   ;;  %s1581_s18 = sphi %s1637_s18, %s2043_s18  }
   0x4   : > { %s1662_s24 = sadd.s32 1, %s1593_s21   ;;  %s135_s25 = sadd.s32 1, %s1589_s20 }
   0x5   : > { %s132_s26 = ssub.s32 %s1593_s21, %s1662_s24  ;;  %p145_p0 = scmp.ne.s32.totalorder %s1589_s20, %s1585_s19 }
   0x6   : > { %p133_p1 = scmp.eq.s32.totalorder %s132_s26, 0  ;;  %p146_p2 = scmp.eq.s32.totalorder %s1658_s22, 1 }
   0x7   : > { %p151_p3 = scmp.ne.s32.totalorder %s1585_s19, %s1581_s18  ;;  %p152_p4 = scmp.eq.s32.totalorder %s1331_s23, 1 }
   0x8   : > { %s1673_s27 = scalar_select %p133_p1, %s1589_s20, %s135_s25  }
   0x9   : > { %p1675_p5 = por %p146_p2, %p145_p0  ;;  %p1679_p6 = por %p152_p4, %p151_p3 }
   0xa   : > { %p1334_p7 = scmp.ge.s32.totalorder %s1593_s21, 1  ;;  %p190_p8 = scmp.lt.s32.totalorder %s1593_s21, 3 }
   0xc   : > { %p191_p9 = pnand %p1334_p7, %p190_p8 }
   0xd   : > { %v1503_v0 = vld [vmem:[%s2036_s1] sm:$0xff] (!%p191_p9)   ;;  %v1504_v1 = vld [vmem:[%s2036_s1 + $0x8] sm:$0xff] (!%p191_p9)   ;;  %p218_p10 = scmp.lt.s32.totalorder (!%p191_p9), %s1658_s22, 1  ;;  %v1505_v2 = vld [vmem:[%s2036_s1 + $0x10] ss:$0 sps:$4 sm:$0x33] (!%p191_p9)  }
   0xe   : > { %194 = sbr.rel (%p191_p9) target bundleno = 717 (0x2cd), region = 40  ;;  %1414 = vmatprep.subr.bf16.mxu0 (!%p191_p9), %v1503_v0  ;;  %vm412_vm0 = vcmask (!%p191_p9), 1041408   ;;  %vm363_vm1 = vcmask (!%p191_p9), 293888   ;;  %vm609_vm2 = vcmask (!%p191_p9), 130048   ;;  %vm747_vm3 = vcmask (!%p191_p9), 123904   ;;  %v1522_v21 = vld [vmem:[%s2038_s3] sm:$0xff] (!%p191_p9)  }
   0xf   : > { %1415 = vmatpush3.bf16.msra.mxu0 (!%p191_p9), %v1503_v0  ;;  %v414_v4 = vsel (!%p191_p9), %vm412_vm0, %v1505_v2, 0  ;;  %v1595_v20 = vmov (!%p191_p9), 0.0   ;;  %vm752_vm4 = vcmask (!%p191_p9), 122880   ;;  %v1596_v22 = vmov (!%p191_p9), 0   ;;  %v1523_v23 = vld [vmem:[%s2038_s3 + $0x8] sm:$0xff] (!%p191_p9)   ;;  %v1524_v24 = vld [vmem:[%s2038_s3 + $0x10] sm:$0xff] (!%p191_p9)  }
  0x10   : > { %1416 = vmatprep.subr.bf16.mxu0 (!%p191_p9), %v1504_v1  ;;  %746 = vst.msk [vmem:[#allocation4] sm:$0xff] (!%p191_p9), %vm609_vm2, %v1595_v20  ;;  %750 = vst.msk [vmem:[#allocation4 + $0x90] sm:$0xff] (!%p191_p9), %vm609_vm2, %v1595_v20  ;;  %1145 = vmatprep.subr.bf16.mxu1 (!%p191_p9), %v1596_v22  ;;  %v1771_v25 = vld [vmem:[%s2037_s2] ss:$0 sm:$0xff] (!%p191_p9)  ;;  %s1597_s16 = smov (!%p191_p9), 16   ;;  %s1598_s17 = smov (!%p191_p9), 32  }
  0x11   : > { %748 = vst.msk [vmem:[#allocation4 + $0x8] sm:$0x3] (!%p191_p9), %vm747_vm3, %v1595_v20  ;;  %751 = vst.msk [vmem:[#allocation4 + $0x98] sm:$0x3] (!%p191_p9), %vm747_vm3, %v1595_v20  ;;  %1146 = vmatpush1.bf16.msra.mxu1 (!%p191_p9), %v1522_v21  ;;  %s1599_s26 = smov (!%p191_p9), 48   ;;  %s1600_s30 = smov (!%p191_p9), 80  }
  0x12   : > { %753 = vst.msk [vmem:[#allocation4] sm:$0x1] (!%p191_p9), %vm752_vm4, %v1595_v20  ;;  %763 = vst.msk [vmem:[#allocation4 + $0x9] sm:$0x1] (!%p191_p9), %vm752_vm4, %v1595_v20  ;;  %1147 = vmatprep.subr.bf16.mxu1 (!%p191_p9), %v1596_v22  ;;  %s1601_s8 = smov (!%p191_p9), 64   ;;  %s1602_s9 = smov (!%p191_p9), 96  }
  0x13   : > { %1417 = vmatpush3.bf16.msra.mxu0 (!%p191_p9), %v1504_v1  ;;  %772 = vst.msk [vmem:[#allocation4 + $0x99] sm:$0x1] (!%p191_p9), %vm752_vm4, %v1595_v20  ;;  %754 = vst.msk [vmem:[#allocation4 + $0x10] sm:$0x1] (!%p191_p9), %vm752_vm4, %v1595_v20  ;;  %s1603_s10 = smov (!%p191_p9), 112   ;;  %vm826_vm5 = vcmask (!%p191_p9), 261248  }
  0x14   : > { %1452 = vmatprep.subr.msk.bf16.mxu0 (!%p191_p9), %vm412_vm0, %v1505_v2  ;;  %755 = vst.msk [vmem:[#allocation4 + $0x20] sm:$0x1] (!%p191_p9), %vm752_vm4, %v1595_v20  ;;  %756 = vst.msk [vmem:[#allocation4 + $0x30] sm:$0x1] (!%p191_p9), %vm752_vm4, %v1595_v20  ;;  %vm859_vm6 = vcmask (!%p191_p9), 392448   ;;  %vm892_vm7 = vcmask (!%p191_p9), 523648  }
  0x15   : > { %s219_s11 = scalar_select %p218_p10, %s1658_s22, 1  ;;  %757 = vst.msk [vmem:[#allocation4 + $0x40] sm:$0x1] %vm752_vm4, %v1595_v20  ;;  %758 = vst.msk [vmem:[#allocation4 + $0x50] sm:$0x1] %vm752_vm4, %v1595_v20  ;;  %1148 = vmatpush1.bf16.msra.mxu1 %v1523_v23  ;;  %vm925_vm8 = vcmask 654848  }
  0x16   : > { %759 = vst.msk [vmem:[#allocation4 + $0x60] sm:$0x1] %vm752_vm4, %v1595_v20  ;;  %760 = vst.msk [vmem:[#allocation4 + $0x70] sm:$0x1] %vm752_vm4, %v1595_v20  ;;  %1149 = vmatprep.subr.bf16.mxu1 %v1596_v22  ;;  %vm958_vm9 = vcmask 786048   ;;  %vm992_vm10 = vcmask 917248  }
  0x17   : > { %s1393_s12 = sshll.u32 %s219_s11, 7  ;;  %1419 = vmatpush3.bf16.msra.mxu0 %v414_v4  ;;  %761 = vst.msk [vmem:[#allocation4 + $0x80] sm:$0x1] %vm752_vm4, %v1595_v20  ;;  %764 = vst.msk [vmem:[#allocation4 + $0x19] sm:$0x1] %vm752_vm4, %v1595_v20  ;;  %vm1025_vm11 = vcmask 1048448  }
  0x18   : > { %s1699_s15 = scalar_lea.vmem %s2035_s0, %s1393_s12  ;;  %765 = vst.msk [vmem:[#allocation4 + $0x29] sm:$0x1] %vm752_vm4, %v1595_v20  ;;  %766 = vst.msk [vmem:[#allocation4 + $0x39] sm:$0x1] %vm752_vm4, %v1595_v20  ;;  %vm1218_vm12 = vcmask 261120   ;;  %s215_s13 = sand.u32 1, %s1585_s19  }
  0x19   : > { %v1506_v3 = vld [vmem:[%s1699_s15] sm:$0xff]   ;;  %v1507_v5 = vld [vmem:[%s1699_s15 + $0x8] sm:$0xff]   ;;  %v1508_v6 = vld [vmem:[%s1699_s15 + $0x10] sm:$0xff]   ;;  %767 = vst.msk [vmem:[#allocation4 + $0x49] sm:$0x1] %vm752_vm4, %v1595_v20  ;;  %1150 = vmatpush1.bf16.msra.mxu1 %v1524_v24  ;;  %s1335_s14 = sshll.u32 %s215_s13, 4 }
  0x1a   : > { %1420 = vmatprep.mubr.msk.bf16.mxu0 %vm363_vm1, %v1506_v3  ;;  %v1509_v7 = vld [vmem:[%s1699_s15 + $0x18] sm:$0xff]   ;;  %v1510_v8 = vld [vmem:[%s1699_s15 + $0x20] sm:$0xff]   ;;  %v1511_v9 = vld [vmem:[%s1699_s15 + $0x28] sm:$0xff]   ;;  %768 = vst.msk [vmem:[#allocation4 + $0x59] sm:$0x1] %vm752_vm4, %v1595_v20  ;;  %1151 = vmatprep.subr.bf16.mxu1 %v1596_v22  ;;  %s1604_s6 = smov [#allocation8]  }
  0x1b   : > { %1421 = vmatmul.mubr.msk.bf16.vlgmr.msra.gmra.mrb[0].mxu0 %vm363_vm1, %v1507_v5  ;;  %v1512_v10 = vld [vmem:[%s1699_s15 + $0x30] sm:$0xff]   ;;  %v1513_v11 = vld [vmem:[%s1699_s15 + $0x38] sm:$0xff]   ;;  %v1514_v12 = vld [vmem:[%s1699_s15 + $0x40] sm:$0xff]   ;;  %769 = vst.msk [vmem:[#allocation4 + $0x69] sm:$0x1] %vm752_vm4, %v1595_v20  ;;  %s1535_s7 = sshll.u32 %s1604_s6, 4  ;;  %s1536_s7 = int_to_ptr.vmem [resolvable:$false] %s1535_s7 }
  0x1c   : > { %1424 = vmatprep.mubr.msk.bf16.mxu0 %vm363_vm1, %v1508_v6  ;;  %v1515_v13 = vld [vmem:[%s1699_s15 + $0x48] sm:$0xff]   ;;  %v1516_v14 = vld [vmem:[%s1699_s15 + $0x50] sm:$0xff]   ;;  %v1517_v15 = vld [vmem:[%s1699_s15 + $0x58] sm:$0xff]   ;;  %770 = vst.msk [vmem:[#allocation4 + $0x79] sm:$0x1] %vm752_vm4, %v1595_v20 }
  0x1d   : > { %v1518_v16 = vld [vmem:[%s1699_s15 + $0x60] sm:$0xff]   ;;  %v1519_v17 = vld [vmem:[%s1699_s15 + $0x68] sm:$0xff]   ;;  %v1520_v18 = vld [vmem:[%s1699_s15 + $0x70] sm:$0xff]   ;;  %771 = vst.msk [vmem:[#allocation4 + $0x89] sm:$0x1] %vm752_vm4, %v1595_v20 }
  0x1e   : > { %v1521_v19 = vld [vmem:[%s1699_s15 + $0x78] sm:$0xff]   ;;  %762 = vst.msk [vmem:[#allocation4 + $0x90] sm:$0x1] %vm752_vm4, %v1595_v20  ;;  %s217_s15 = scalar_lea.vmem [#allocation8], %s1335_s14 }
  0x23   : > { %1425 = vmatmul.mubr.msk.bf16.gmra.mrb[4].mxu0 %vm363_vm1, %v1509_v7 }
  0x24   : > { %1428 = vmatprep.mubr.msk.bf16.mxu0 %vm363_vm1, %v1510_v8 }
  0x2b   : > { %1429 = vmatmul.mubr.msk.bf16.gmra.mrb[8].mxu0 %vm363_vm1, %v1511_v9 }
  0x2c   : > { %1432 = vmatprep.mubr.msk.bf16.mxu0 %vm363_vm1, %v1512_v10 }
  0x33   : > { %1433 = vmatmul.mubr.msk.bf16.gmra.mrb[12].mxu0 %vm363_vm1, %v1513_v11 }
  0x34   : > { %1436 = vmatprep.mubr.msk.bf16.mxu0 %vm363_vm1, %v1514_v12 }
  0x3b   : > { %1437 = vmatmul.mubr.msk.bf16.gmra.mrb[16].mxu0 %vm363_vm1, %v1515_v13 }
  0x3c   : > { %1440 = vmatprep.mubr.msk.bf16.mxu0 %vm363_vm1, %v1516_v14 }
  0x43   : > { %1441 = vmatmul.mubr.msk.bf16.gmra.mrb[20].mxu0 %vm363_vm1, %v1517_v15  ;;  %v1525_v15 = vld [vmem:[%s2038_s3 + $0x18] sm:$0xff]  }
  0x44   : > { %1444 = vmatprep.mubr.msk.bf16.mxu0 %vm363_vm1, %v1518_v16  ;;  %1152 = vmatpush1.bf16.msra.mxu1 %v1525_v15 }
  0x45   : > { %1153 = vmatprep.subr.bf16.mxu1 %v1596_v22 }
  0x4b   : > { %1445 = vmatmul.mubr.msk.bf16.gmra.mrb[24].mxu0 %vm363_vm1, %v1519_v17 }
  0x4c   : > { %1448 = vmatprep.mubr.msk.bf16.mxu0 %vm363_vm1, %v1520_v18 }
  0x53   : > { %1449 = vmatmul.mubr.msk.bf16.gmra.mrb[28].mxu0 %vm363_vm1, %v1521_v19 }
  0xee   : > { %v1422_v26 = vpop.f32.mrb[0].mxu0 }
  0xef   : > { %v459_v27 = vadd.f32 %v1422_v26, %v1771_v25  ;;  %v450_v28 = vpop.f32.mrb[1].mxu0 }
  0xf0   : > { %v451_v29 = vadd.f32 %v1771_v25, %v450_v28  ;;  %v1423_v30 = vpop.f32.mrb[2].mxu0 }
  0xf1   : > { %v579_v31 = vmax.f32 %v459_v27, 0.0  ;;  %v462_v32 = vadd.f32 %v1423_v30, %v1771_v25  ;;  %v453_v33 = vpop.f32.mrb[3].mxu0 }
  0xf2   : > { %v577_v34 = vmax.f32 %v451_v29, 0.0  ;;  %v454_v35 = vadd.f32 %v1771_v25, %v453_v33  ;;  %v1526_v29 = vld [vmem:[%s2038_s3 + $0x20] sm:$0xff]  }
  0xf3   : > { %612 = vst.msk [vmem:[#allocation2 + $0x10] sm:$0xff] %vm609_vm2, %v579_v31  ;;  %v580_v36 = vmax.f32 %v462_v32, 0.0  ;;  %1154 = vmatpush1.bf16.msra.mxu1 %v1526_v29 }
  0xf4   : > { %610 = vst.msk [vmem:[#allocation2] sm:$0xff] %vm609_vm2, %v577_v34  ;;  %v578_v37 = vmax.f32 %v454_v35, 0.0  ;;  %1155 = vmatprep.subr.bf16.mxu1 %v1596_v22 }
  0xf5   : > { %613 = vst.msk [vmem:[#allocation2 + $0x18] sm:$0xff] %vm609_vm2, %v580_v36  ;;  %v798_v36 = vld [vmem:[#allocation4 + $0x1] sm:$0xff] }
  0xf6   : > { %611 = vst.msk [vmem:[#allocation2 + $0x8] sm:$0xff] %vm609_vm2, %v578_v37  ;;  %v1426_v38 = vpop.f32.mrb[4].mxu0 }
  0xf7   : > { %v475_v39 = vadd.f32 %v1426_v38, %v1771_v25  ;;  %v466_v40 = vpop.f32.mrb[5].mxu0 }
  0xf8   : > { %v467_v41 = vadd.f32 %v1771_v25, %v466_v40  ;;  %v1427_v42 = vpop.f32.mrb[6].mxu0 }
  0xf9   : > { %v583_v43 = vmax.f32 %v475_v39, 0.0  ;;  %v478_v44 = vadd.f32 %v1427_v42, %v1771_v25  ;;  %v469_v45 = vpop.f32.mrb[7].mxu0 }
  0xfa   : > { %v659_v46 = vld [vmem:[#allocation2 + $0x10] sm:$0xff]  ;;  %v581_v47 = vmax.f32 %v467_v41, 0.0  ;;  %v470_v48 = vadd.f32 %v1771_v25, %v469_v45  ;;  %v1527_v41 = vld [vmem:[%s2038_s3 + $0x28] sm:$0xff]   ;;  %v782_v45 = vld [vmem:[#allocation4] sm:$0xff] }
  0xfb   : > { %v642_v49 = vld [vmem:[#allocation2] sm:$0xff]  ;;  %616 = vst.msk [vmem:[#allocation2 + $0x30] sm:$0xff] %vm609_vm2, %v583_v43  ;;  %v584_v50 = vmax.f32 %v478_v44, 0.0  ;;  %1156 = vmatpush1.bf16.msra.mxu1 %v1527_v41 }
  0xfc   : > { %v675_v51 = vmax.f32 %v642_v49, %v659_v46  ;;  %v660_v52 = vld [vmem:[#allocation2 + $0x18] sm:$0xff]  ;;  %614 = vst.msk [vmem:[#allocation2 + $0x20] sm:$0xff] %vm609_vm2, %v581_v47  ;;  %v582_v53 = vmax.f32 %v470_v48, 0.0  ;;  %1157 = vmatprep.subr.bf16.mxu1 %v1596_v22 }
  0xfd   : > { %v643_v54 = vld [vmem:[#allocation2 + $0x8] sm:$0xff]  ;;  %617 = vst.msk [vmem:[#allocation2 + $0x38] sm:$0xff] %vm609_vm2, %v584_v50 }
  0xfe   : > { %691 = vst.msk [vmem:[#allocation3] sm:$0xff] %vm609_vm2, %v675_v51  ;;  %v676_v55 = vmax.f32 %v643_v54, %v660_v52  ;;  %615 = vst.msk [vmem:[#allocation2 + $0x28] sm:$0xff] %vm609_vm2, %v582_v53  ;;  %v1430_v56 = vpop.f32.mrb[8].mxu0 }
  0xff   : > { %v491_v57 = vadd.f32 %v1430_v56, %v1771_v25  ;;  %v482_v58 = vpop.f32.mrb[9].mxu0 }
 0x100   : > { %692 = vst.msk [vmem:[#allocation3 + $0x8] sm:$0xff] %vm609_vm2, %v676_v55  ;;  %v483_v59 = vadd.f32 %v1771_v25, %v482_v58  ;;  %v1431_v60 = vpop.f32.mrb[10].mxu0  ;;  %v831_v55 = vld [vmem:[#allocation4 + $0x2] sm:$0xff] }
 0x101   : > { %v587_v61 = vmax.f32 %v491_v57, 0.0  ;;  %v494_v62 = vadd.f32 %v1431_v60, %v1771_v25  ;;  %v485_v63 = vpop.f32.mrb[11].mxu0  ;;  %v1528_v60 = vld [vmem:[%s2038_s3 + $0x30] sm:$0xff]  }
 0x102   : > { %v661_v0 = vld [vmem:[#allocation2 + $0x30] sm:$0xff]  ;;  %v585_v1 = vmax.f32 %v483_v59, 0.0  ;;  %v486_v2 = vadd.f32 %v1771_v25, %v485_v63  ;;  %1158 = vmatpush1.bf16.msra.mxu1 %v1528_v60 }
 0x103   : > { %v644_v3 = vld [vmem:[#allocation2 + $0x20] sm:$0xff]  ;;  %620 = vst.msk [vmem:[#allocation2 + $0x50] sm:$0xff] %vm609_vm2, %v587_v61  ;;  %v588_v4 = vmax.f32 %v494_v62, 0.0  ;;  %1159 = vmatprep.subr.bf16.mxu1 %v1596_v22 }
 0x104   : > { %v677_v5 = vmax.f32 %v644_v3, %v661_v0  ;;  %v662_v6 = vld [vmem:[#allocation2 + $0x38] sm:$0xff]  ;;  %618 = vst.msk [vmem:[#allocation2 + $0x40] sm:$0xff] %vm609_vm2, %v585_v1  ;;  %v586_v7 = vmax.f32 %v486_v2, 0.0 }
 0x105   : > { %v645_v8 = vld [vmem:[#allocation2 + $0x28] sm:$0xff]  ;;  %621 = vst.msk [vmem:[#allocation2 + $0x58] sm:$0xff] %vm609_vm2, %v588_v4 }
 0x106   : > { %693 = vst.msk [vmem:[#allocation3 + $0x10] sm:$0xff] %vm609_vm2, %v677_v5  ;;  %v678_v9 = vmax.f32 %v645_v8, %v662_v6  ;;  %619 = vst.msk [vmem:[#allocation2 + $0x48] sm:$0xff] %vm609_vm2, %v586_v7  ;;  %v1434_v10 = vpop.f32.mrb[12].mxu0 }
 0x107   : > { %v507_v11 = vadd.f32 %v1434_v10, %v1771_v25  ;;  %v498_v12 = vpop.f32.mrb[13].mxu0  ;;  %v707_v13 = vld [vmem:[#allocation3] ss:$2 sm:$0xff]  ;;  %v723_v14 = vld [vmem:[#allocation3 + $0x1] ss:$2 sm:$0xff] }
 0x108   : > { %694 = vst.msk [vmem:[#allocation3 + $0x18] sm:$0xff] %vm609_vm2, %v678_v9  ;;  %v499_v16 = vadd.f32 %v1771_v25, %v498_v12  ;;  %v1435_v17 = vpop.f32.mrb[14].mxu0  ;;  %v738_v18 = vmax.f32 %v707_v13, %v723_v14 }
 0x109   : > { %v591_v19 = vmax.f32 %v507_v11, 0.0  ;;  %v510_v20 = vadd.f32 %v1435_v17, %v1771_v25  ;;  %v501_v21 = vpop.f32.mrb[15].mxu0  ;;  %v1529_v11 = vld [vmem:[%s2038_s3 + $0x38] sm:$0xff]  }
 0x10a   : > { %v663_v23 = vld [vmem:[#allocation2 + $0x50] sm:$0xff]  ;;  %v589_v24 = vmax.f32 %v499_v16, 0.0  ;;  %v502_v26 = vadd.f32 %v1771_v25, %v501_v21  ;;  %774 = vst.msk [vmem:[#allocation4 + $0x11] sm:$0xff] %vm609_vm2, %v738_v18  ;;  %1160 = vmatpush1.bf16.msra.mxu1 %v1529_v11 }
 0x10b   : > { %v646_v27 = vld [vmem:[#allocation2 + $0x40] sm:$0xff]  ;;  %624 = vst.msk [vmem:[#allocation2 + $0x70] sm:$0xff] %vm609_vm2, %v591_v19  ;;  %v592_v28 = vmax.f32 %v510_v20, 0.0  ;;  %1161 = vmatprep.subr.bf16.mxu1 %v1596_v22 }
 0x10c   : > { %v679_v30 = vmax.f32 %v646_v27, %v663_v23  ;;  %v664_v31 = vld [vmem:[#allocation2 + $0x58] sm:$0xff]  ;;  %622 = vst.msk [vmem:[#allocation2 + $0x60] sm:$0xff] %vm609_vm2, %v589_v24  ;;  %v590_v32 = vmax.f32 %v502_v26, 0.0 }
 0x10d   : > { %v647_v33 = vld [vmem:[#allocation2 + $0x48] sm:$0xff]  ;;  %625 = vst.msk [vmem:[#allocation2 + $0x78] sm:$0xff] %vm609_vm2, %v592_v28 }
 0x10e   : > { %695 = vst.msk [vmem:[#allocation3 + $0x20] sm:$0xff] %vm609_vm2, %v679_v30  ;;  %v680_v34 = vmax.f32 %v647_v33, %v664_v31  ;;  %623 = vst.msk [vmem:[#allocation2 + $0x68] sm:$0xff] %vm609_vm2, %v590_v32  ;;  %v1438_v35 = vpop.f32.mrb[16].mxu0  ;;  %v1530_v30 = vld [vmem:[%s2038_s3 + $0x40] sm:$0xff]  }
 0x10f   : > { %v523_v37 = vadd.f32 %v1438_v35, %v1771_v25  ;;  %v514_v38 = vpop.f32.mrb[17].mxu0  ;;  %v709_v39 = vld [vmem:[#allocation3 + $0x10] ss:$2 sm:$0xff]  ;;  %v725_v40 = vld [vmem:[#allocation3 + $0x11] ss:$2 sm:$0xff]  ;;  %1162 = vmatpush1.bf16.msra.mxu1 %v1530_v30 }
 0x110   : > { %696 = vst.msk [vmem:[#allocation3 + $0x28] sm:$0xff] %vm609_vm2, %v680_v34  ;;  %v515_v42 = vadd.f32 %v1771_v25, %v514_v38  ;;  %v1439_v43 = vpop.f32.mrb[18].mxu0  ;;  %v739_v44 = vmax.f32 %v709_v39, %v725_v40 }
 0x111   : > { %v595_v46 = vmax.f32 %v523_v37, 0.0  ;;  %v526_v47 = vadd.f32 %v1439_v43, %v1771_v25  ;;  %v517_v48 = vpop.f32.mrb[19].mxu0  ;;  %v1826_v49 = vld [vmem:[#allocation4 + $0x11] sm:$0xff] }
 0x112   : > { %v1828_v50 = vld [vmem:[#allocation4 + $0x10] sm:$0xff]  ;;  %v593_v52 = vmax.f32 %v515_v42, 0.0  ;;  %v518_v53 = vadd.f32 %v1771_v25, %v517_v48  ;;  %v806_v54 = vpack.c.bf16 %v1826_v49, %v798_v36  ;;  %775 = vst.msk [vmem:[#allocation4 + $0x21] sm:$0xff] %vm609_vm2, %v739_v44 }
 0x113   : > { %v665_v51 = vld [vmem:[#allocation2 + $0x70] sm:$0xff]  ;;  %v648_v56 = vld [vmem:[#allocation2 + $0x60] sm:$0xff]  ;;  %628 = vst.msk [vmem:[#allocation2 + $0x90] sm:$0xff] %vm609_vm2, %v595_v46  ;;  %v596_v57 = vmax.f32 %v526_v47, 0.0  ;;  %v790_v59 = vpack.c.bf16 %v1828_v50, %v782_v45 }
 0x114   : > { %v832_v58 = vld [vmem:[#allocation4 + $0x12] sm:$0xff]  ;;  %v681_v61 = vmax.f32 %v648_v56, %v665_v51  ;;  %626 = vst.msk [vmem:[#allocation2 + $0x80] sm:$0xff] %vm609_vm2, %v593_v52  ;;  %v594_v63 = vmax.f32 %v518_v53, 0.0  ;;  %814 = vrot.lane.b32.xlu0 %v806_v54, %s1597_s16 }
 0x115   : > { %v666_v62 = vld [vmem:[#allocation2 + $0x78] sm:$0xff]  ;;  %v649_v0 = vld [vmem:[#allocation2 + $0x68] sm:$0xff]  ;;  %629 = vst.msk [vmem:[#allocation2 + $0x98] sm:$0xff] %vm609_vm2, %v596_v57  ;;  %794 = vst.msk [vmem:[#allocation5] sm:$0xff] %vm609_vm2, %v790_v59  ;;  %v839_v3 = vpack.c.bf16 %v832_v58, %v831_v55 }
 0x116   : > { %697 = vst.msk [vmem:[#allocation3 + $0x30] sm:$0xff] %vm609_vm2, %v681_v61  ;;  %v682_v1 = vmax.f32 %v649_v0, %v666_v62  ;;  %627 = vst.msk [vmem:[#allocation2 + $0x88] sm:$0xff] %vm609_vm2, %v594_v63  ;;  %v1442_v2 = vpop.f32.mrb[20].mxu0 }
 0x117   : > { %v539_v4 = vadd.f32 %v1442_v2, %v1771_v25  ;;  %v530_v5 = vpop.f32.mrb[21].mxu0  ;;  %v711_v6 = vld [vmem:[#allocation3 + $0x20] ss:$2 sm:$0xff]  ;;  %v727_v7 = vld [vmem:[#allocation3 + $0x21] ss:$2 sm:$0xff] }
 0x118   : > { %698 = vst.msk [vmem:[#allocation3 + $0x38] sm:$0xff] %vm609_vm2, %v682_v1  ;;  %v531_v8 = vadd.f32 %v1771_v25, %v530_v5  ;;  %v1443_v9 = vpop.f32.mrb[22].mxu0  ;;  %847 = vrot.lane.b32.xlu0 %v839_v3, %s1598_s17  ;;  %v740_v10 = vmax.f32 %v711_v6, %v727_v7 }
 0x119   : > { %v599_v12 = vmax.f32 %v539_v4, 0.0  ;;  %v542_v13 = vadd.f32 %v1443_v9, %v1771_v25  ;;  %v533_v14 = vpop.f32.mrb[23].mxu0  ;;  %v865_v15 = vld [vmem:[#allocation4 + $0x20] sm:$0xff] }
 0x11a   : > { %v931_v16 = vld [vmem:[#allocation4 + $0x22] sm:$0xff]  ;;  %v667_v17 = vld [vmem:[#allocation2 + $0x90] sm:$0xff]  ;;  %v597_v18 = vmax.f32 %v531_v8, 0.0  ;;  %v534_v19 = vadd.f32 %v1771_v25, %v533_v14  ;;  %v872_v20 = vpack.c.bf16 %v865_v15, %v1828_v50  ;;  %776 = vst.msk [vmem:[#allocation4 + $0x31] sm:$0xff] %vm609_vm2, %v740_v10 }
 0x11b   : > { %v938_v21 = vpack.c.bf16 %v931_v16, %v832_v58  ;;  %v650_v23 = vld [vmem:[#allocation2 + $0x80] sm:$0xff]  ;;  %632 = vst.msk [vmem:[#allocation2 + $0xb0] sm:$0xff] %vm609_vm2, %v599_v12  ;;  %v600_v24 = vmax.f32 %v542_v13, 0.0 }
 0x11c   : > { %v898_v26 = vld [vmem:[#allocation4 + $0x21] sm:$0xff]  ;;  %v683_v27 = vmax.f32 %v650_v23, %v667_v17  ;;  %v668_v28 = vld [vmem:[#allocation2 + $0x98] sm:$0xff]  ;;  %630 = vst.msk [vmem:[#allocation2 + $0xa0] sm:$0xff] %vm609_vm2, %v597_v18  ;;  %v598_v29 = vmax.f32 %v534_v19, 0.0  ;;  %880 = vrot.lane.b32.xlu1 %v872_v20, %s1599_s26 }
 0x11d   : > { %946 = vrot.lane.b32.xlu0 %v938_v21, %s1600_s30  ;;  %v651_v31 = vld [vmem:[#allocation2 + $0x88] sm:$0xff]  ;;  %633 = vst.msk [vmem:[#allocation2 + $0xb8] sm:$0xff] %vm609_vm2, %v600_v24  ;;  %v905_v33 = vpack.c.bf16 %v898_v26, %v1826_v49 }
 0x11e   : > { %699 = vst.msk [vmem:[#allocation3 + $0x40] sm:$0xff] %vm609_vm2, %v683_v27  ;;  %v684_v22 = vmax.f32 %v651_v31, %v668_v28  ;;  %631 = vst.msk [vmem:[#allocation2 + $0xa8] sm:$0xff] %vm609_vm2, %v598_v29  ;;  %v1446_v32 = vpop.f32.mrb[24].mxu0 }
 0x11f   : > { %v555_v34 = vadd.f32 %v1446_v32, %v1771_v25  ;;  %v546_v35 = vpop.f32.mrb[25].mxu0  ;;  %v713_v36 = vld [vmem:[#allocation3 + $0x30] ss:$2 sm:$0xff]  ;;  %v729_v37 = vld [vmem:[#allocation3 + $0x31] ss:$2 sm:$0xff] }
 0x120   : > { %700 = vst.msk [vmem:[#allocation3 + $0x48] sm:$0xff] %vm609_vm2, %v684_v22  ;;  %v547_v38 = vadd.f32 %v1771_v25, %v546_v35  ;;  %v1447_v39 = vpop.f32.mrb[26].mxu0  ;;  %913 = vrot.lane.b32.xlu1 %v905_v33, %s1601_s8  ;;  %v741_v40 = vmax.f32 %v713_v36, %v729_v37 }
 0x121   : > { %v603_v41 = vmax.f32 %v555_v34, 0.0  ;;  %v558_v42 = vadd.f32 %v1447_v39, %v1771_v25  ;;  %v549_v43 = vpop.f32.mrb[27].mxu0  ;;  %v965_v44 = vld [vmem:[#allocation4 + $0x30] sm:$0xff] }
 0x122   : > { %v998_v45 = vld [vmem:[#allocation4 + $0x31] sm:$0xff]  ;;  %v601_v48 = vmax.f32 %v547_v38, 0.0  ;;  %v550_v49 = vadd.f32 %v1771_v25, %v549_v43  ;;  %v972_v50 = vpack.c.bf16 %v965_v44, %v865_v15  ;;  %777 = vst.msk [vmem:[#allocation4 + $0x41] sm:$0xff] %vm609_vm2, %v741_v40 }
 0x123   : > { %v1874_v46 = vld [vmem:[#allocation4 + $0x32] sm:$0xff]  ;;  %v1005_v51 = vpack.c.bf16 %v998_v45, %v898_v26  ;;  %v652_v52 = vld [vmem:[#allocation2 + $0xa0] sm:$0xff]  ;;  %636 = vst.msk [vmem:[#allocation2 + $0xd0] sm:$0xff] %vm609_vm2, %v603_v41  ;;  %v604_v53 = vmax.f32 %v558_v42, 0.0 }
 0x124   : > { %v669_v47 = vld [vmem:[#allocation2 + $0xb0] sm:$0xff]  ;;  %v840_v54 = vpack.c.bf16 %v1874_v46, %v931_v16  ;;  %v670_v56 = vld [vmem:[#allocation2 + $0xb8] sm:$0xff]  ;;  %634 = vst.msk [vmem:[#allocation2 + $0xc0] sm:$0xff] %vm609_vm2, %v601_v48  ;;  %v602_v57 = vmax.f32 %v550_v49, 0.0  ;;  %980 = vrot.lane.b32.xlu1 %v972_v50, %s1602_s9  ;;  %795 = vst.msk [vmem:[#allocation5 + $0x10] sm:$0xff] %vm609_vm2, %v972_v50 }
 0x125   : > { %v685_v55 = vmax.f32 %v652_v52, %v669_v47  ;;  %1013 = vrot.lane.b32.xlu0 %v1005_v51, %s1603_s10  ;;  %v653_v58 = vld [vmem:[#allocation2 + $0xa8] sm:$0xff]  ;;  %637 = vst.msk [vmem:[#allocation2 + $0xd8] sm:$0xff] %vm609_vm2, %v604_v53 }
 0x126   : > { %1042 = vst.msk [vmem:[#allocation5 + $0x8] sm:$0xff] %vm609_vm2, %v840_v54  ;;  %v686_v59 = vmax.f32 %v653_v58, %v670_v56  ;;  %635 = vst.msk [vmem:[#allocation2 + $0xc8] sm:$0xff] %vm609_vm2, %v602_v57  ;;  %v1450_v60 = vpop.f32.mrb[28].mxu0  ;;  %v1037_v57 = vld [vmem:[#allocation4 + $0x92] sm:$0xff] }
 0x127   : > { %701 = vst.msk [vmem:[#allocation3 + $0x50] sm:$0xff] %vm609_vm2, %v685_v55  ;;  %v571_v61 = vadd.f32 %v1450_v60, %v1771_v25  ;;  %v562_v62 = vpop.f32.mrb[29].mxu0  ;;  %v715_v63 = vld [vmem:[#allocation3 + $0x40] ss:$2 sm:$0xff]  ;;  %v731_v0 = vld [vmem:[#allocation3 + $0x41] ss:$2 sm:$0xff] }
 0x128   : > { %702 = vst.msk [vmem:[#allocation3 + $0x58] sm:$0xff] %vm609_vm2, %v686_v59  ;;  %v563_v1 = vadd.f32 %v1771_v25, %v562_v62  ;;  %v1451_v2 = vpop.f32.mrb[30].mxu0  ;;  %816 = vrot.lane.b32.xlu1 %v1005_v51, %s1597_s16  ;;  %v742_v3 = vmax.f32 %v715_v63, %v731_v0  ;;  %v971_v63 = vld [vmem:[#allocation4 + $0x90] sm:$0xff] }
 0x129   : > { %849 = vrot.lane.b32.xlu0 %v840_v54, %s1598_s17  ;;  %v607_v4 = vmax.f32 %v571_v61, 0.0  ;;  %v574_v5 = vadd.f32 %v1451_v2, %v1771_v25  ;;  %v565_v6 = vpop.f32.mrb[31].mxu0  ;;  %v867_v7 = vld [vmem:[#allocation4 + $0x40] sm:$0xff] }
 0x12a   : > { %v900_v8 = vld [vmem:[#allocation4 + $0x41] sm:$0xff]  ;;  %v671_v9 = vld [vmem:[#allocation2 + $0xd0] sm:$0xff]  ;;  %v605_v10 = vmax.f32 %v563_v1, 0.0  ;;  %v566_v11 = vadd.f32 %v1771_v25, %v565_v6  ;;  %v873_v12 = vpack.c.bf16 %v867_v7, %v965_v44  ;;  %778 = vst.msk [vmem:[#allocation4 + $0x51] sm:$0xff] %vm609_vm2, %v742_v3 }
 0x12b   : > { %v906_v13 = vpack.c.bf16 %v900_v8, %v998_v45  ;;  %v654_v14 = vld [vmem:[#allocation2 + $0xc0] sm:$0xff]  ;;  %640 = vst.msk [vmem:[#allocation2 + $0xf0] sm:$0xff] %vm609_vm2, %v607_v4  ;;  %v608_v15 = vmax.f32 %v574_v5, 0.0  ;;  %v1004_v3 = vld [vmem:[#allocation4 + $0x91] sm:$0xff] }
 0x12c   : > { %v933_v16 = vld [vmem:[#allocation4 + $0x42] sm:$0xff]  ;;  %v687_v17 = vmax.f32 %v654_v14, %v671_v9  ;;  %v672_v18 = vld [vmem:[#allocation2 + $0xd8] sm:$0xff]  ;;  %638 = vst.msk [vmem:[#allocation2 + $0xe0] sm:$0xff] %vm609_vm2, %v605_v10  ;;  %v606_v19 = vmax.f32 %v566_v11, 0.0  ;;  %882 = vrot.lane.b32.xlu1 %v873_v12, %s1599_s26 }
 0x12d   : > { %v1047_v20 = vld [vmem:[#allocation5 + $0x8] sm:$0xff]  ;;  %915 = vrot.lane.b32.xlu0 %v906_v13, %s1601_s8  ;;  %641 = vst.msk [vmem:[#allocation2 + $0xf8] sm:$0xff] %vm609_vm2, %v608_v15  ;;  %v939_v23 = vpack.c.bf16 %v933_v16, %v1874_v46 }
 0x12e   : > { %v655_v25 = vld [vmem:[#allocation2 + $0xc8] sm:$0xff]  ;;  %1384 = vmatprep.mubr.msk.bf16.mxu1 %vm609_vm2, %v1047_v20  ;;  %703 = vst.msk [vmem:[#allocation3 + $0x60] sm:$0xff] %vm609_vm2, %v687_v17  ;;  %639 = vst.msk [vmem:[#allocation2 + $0xe8] sm:$0xff] %vm609_vm2, %v606_v19 }
 0x12f   : > { %v688_v21 = vmax.f32 %v655_v25, %v672_v18  ;;  %v717_v24 = vld [vmem:[#allocation3 + $0x50] ss:$2 sm:$0xff]  ;;  %v733_v26 = vld [vmem:[#allocation3 + $0x51] ss:$2 sm:$0xff] }
 0x130   : > { %948 = vrot.lane.b32.xlu1 %v939_v23, %s1600_s30  ;;  %v743_v27 = vmax.f32 %v717_v24, %v733_v26 }
 0x131   : > { %704 = vst.msk [vmem:[#allocation3 + $0x68] sm:$0xff] %vm609_vm2, %v688_v21  ;;  %v1000_v28 = vld [vmem:[#allocation4 + $0x51] sm:$0xff] }
 0x132   : > { %v967_v29 = vld [vmem:[#allocation4 + $0x50] sm:$0xff]  ;;  %v1006_v22 = vpack.c.bf16 %v1000_v28, %v900_v8  ;;  %779 = vst.msk [vmem:[#allocation4 + $0x61] sm:$0xff] %vm609_vm2, %v743_v27 }
 0x133   : > { %v836_v30 = vld [vmem:[#allocation4 + $0x52] sm:$0xff]  ;;  %v973_v32 = vpack.c.bf16 %v967_v29, %v867_v7  ;;  %v656_v34 = vld [vmem:[#allocation2 + $0xe0] sm:$0xff] }
 0x134   : > { %v673_v31 = vld [vmem:[#allocation2 + $0xf0] sm:$0xff]  ;;  %v841_v33 = vpack.c.bf16 %v836_v30, %v933_v16  ;;  %v674_v36 = vld [vmem:[#allocation2 + $0xf8] sm:$0xff]  ;;  %1015 = vrot.lane.b32.xlu1 %v1006_v22, %s1603_s10 }
 0x135   : > { %v689_v35 = vmax.f32 %v656_v34, %v673_v31  ;;  %982 = vrot.lane.b32.xlu0 %v973_v32, %s1602_s9  ;;  %796 = vst.msk [vmem:[#allocation5 + $0x20] sm:$0xff] %vm609_vm2, %v973_v32  ;;  %v657_v37 = vld [vmem:[#allocation2 + $0xe8] sm:$0xff] }
 0x136   : > { %1043 = vst.msk [vmem:[#allocation5 + $0x18] sm:$0xff] %vm609_vm2, %v841_v33  ;;  %v690_v38 = vmax.f32 %v657_v37, %v674_v36 }
 0x137   : > { %705 = vst.msk [vmem:[#allocation3 + $0x70] sm:$0xff] %vm609_vm2, %v689_v35 }
 0x138   : > { %v719_v39 = vld [vmem:[#allocation3 + $0x60] ss:$2 sm:$0xff]  ;;  %v735_v40 = vld [vmem:[#allocation3 + $0x61] ss:$2 sm:$0xff]  ;;  %706 = vst.msk [vmem:[#allocation3 + $0x78] sm:$0xff] %vm609_vm2, %v690_v38  ;;  %851 = vrot.lane.b32.xlu1 %v841_v33, %s1598_s17 }
 0x139   : > { %818 = vrot.lane.b32.xlu0 %v1006_v22, %s1597_s16  ;;  %v744_v41 = vmax.f32 %v719_v39, %v735_v40  ;;  %v902_v42 = vld [vmem:[#allocation4 + $0x61] sm:$0xff]  ;;  %v1374_v40 = vld [vmem:[%s2039_s4] ss:$0 sm:$0xff] }
 0x13a   : > { %v869_v43 = vld [vmem:[#allocation4 + $0x60] sm:$0xff]  ;;  %v907_v44 = vpack.c.bf16 %v902_v42, %v1000_v28 }
 0x13b   : > { %v874_v45 = vpack.c.bf16 %v869_v43, %v967_v29  ;;  %780 = vst.msk [vmem:[#allocation4 + $0x71] sm:$0xff] %vm609_vm2, %v744_v41  ;;  %v935_v46 = vld [vmem:[#allocation4 + $0x62] sm:$0xff] }
 0x13c   : > { %917 = vrot.lane.b32.xlu1 %v907_v44, %s1601_s8  ;;  %v940_v47 = vpack.c.bf16 %v935_v46, %v836_v30 }
 0x13d   : > { %884 = vrot.lane.b32.xlu0 %v874_v45, %s1599_s26  ;;  %v1049_v17 = vld [vmem:[#allocation5 + $0x18] sm:$0xff] }
 0x13f   : > { %v721_v48 = vld [vmem:[#allocation3 + $0x70] ss:$2 sm:$0xff]  ;;  %v737_v49 = vld [vmem:[#allocation3 + $0x71] ss:$2 sm:$0xff] }
 0x140   : > { %v745_v50 = vmax.f32 %v721_v48, %v737_v49 }
 0x141   : > { %950 = vrot.lane.b32.xlu0 %v940_v47, %s1600_s30 }
 0x142   : > { %v969_v51 = vld [vmem:[#allocation4 + $0x70] sm:$0xff]  ;;  %781 = vst.msk [vmem:[#allocation4 + $0x81] sm:$0xff] %vm609_vm2, %v745_v50 }
 0x143   : > { %v1002_v52 = vld [vmem:[#allocation4 + $0x71] sm:$0xff]  ;;  %v974_v54 = vpack.c.bf16 %v969_v51, %v869_v43 }
 0x144   : > { %v838_v53 = vld [vmem:[#allocation4 + $0x72] sm:$0xff]  ;;  %v1007_v55 = vpack.c.bf16 %v1002_v52, %v902_v42 }
 0x145   : > { %v842_v56 = vpack.c.bf16 %v838_v53, %v935_v46  ;;  %984 = vrot.lane.b32.xlu1 %v974_v54, %s1602_s9  ;;  %797 = vst.msk [vmem:[#allocation5 + $0x30] sm:$0xff] %vm609_vm2, %v974_v54 }
 0x146   : > { %1017 = vrot.lane.b32.xlu0 %v1007_v55, %s1603_s10 }
 0x147   : > { %1044 = vst.msk [vmem:[#allocation5 + $0x28] sm:$0xff] %vm609_vm2, %v842_v56 }
 0x149   : > { %820 = vrot.lane.b32.xlu1 %v1007_v55, %s1597_s16  ;;  %v871_v58 = vld [vmem:[#allocation4 + $0x80] sm:$0xff]  ;;  %s1394_s16 = sshll.u32 %s1658_s22, 8 }
 0x14a   : > { %853 = vrot.lane.b32.xlu0 %v842_v56, %s1598_s17  ;;  %v904_v59 = vld [vmem:[#allocation4 + $0x81] sm:$0xff]  ;;  %v875_v61 = vpack.c.bf16 %v871_v58, %v969_v51  ;;  %v975_v2 = vpack.c.bf16 %v971_v63, %v871_v58  ;;  %s1269_s17 = sshll.u32 %s217_s15, 4  ;;  %s1989_s17 = int_to_ptr.vmem [resolvable:$true] %s1269_s17 }
 0x14b   : > { %v937_v60 = vld [vmem:[#allocation4 + $0x82] sm:$0xff]  ;;  %v908_v62 = vpack.c.bf16 %v904_v59, %v1002_v52  ;;  %v1008_v4 = vpack.c.bf16 %v1004_v3, %v904_v59  ;;  %s1531_s22 = scalar_lea.vmem %s1989_s17, 256  ;;  %p1538_p0 = scmp.lt.s32.totalorder %s1989_s17, %s1536_s7 }
 0x14c   : > { %v1041_v0 = vpack.c.bf16 %v1037_v57, %v937_v60  ;;  %v941_v1 = vpack.c.bf16 %v937_v60, %v838_v53  ;;  %p1532_p11 = scmp.ne.s32.totalorder %s1989_s17, %s1531_s22 }
 0x14d   : > { %886 = vrot.lane.b32.xlu1 %v875_v61, %s1599_s26  ;;  %s1987_s26 = scalar_lea.hbm %s2040_s5, %s1394_s16 }
 0x14e   : > { %919 = vrot.lane.b32.xlu0 %v908_v62, %s1601_s8  ;;  %1045 = vst.msk [vmem:[#allocation5 + $0x38] sm:$0xff] %vm609_vm2, %v1041_v0  ;;  %v1051_v27 = vld [vmem:[#allocation5 + $0x28] sm:$0xff]  ;;  %p1533_p12 = pnand %p1532_p11, %p1675_p5  ;;  %s1537_s8 = scalar_lea.vmem %s1536_s7, 512 }
 0x14f   : > { %p1539_p1 = scmp.lt.s32.totalorder %s1537_s8, %s1531_s22 }
 0x150   : > { %p1534_p13 = pneg %p1533_p12 }
 0x151   : > { %952 = vrot.lane.b32.xlu1 %v941_v1, %s1600_s30  ;;  %s1994_s30 = scalar_lea.sflag [#allocation9], %s215_s13  ;;  %p1540_p2 = por %p1539_p1, %p1538_p0 }
 0x152   : > { %986 = vrot.lane.b32.xlu0 %v975_v2, %s1602_s9 }
 0x153   : > { %p1541_p3 = pnand %p1540_p2, %p1534_p13 }
 0x155   : > { %1019 = vrot.lane.b32.xlu1 %v1008_v4, %s1603_s10  ;;  %v1053_v35 = vld [vmem:[#allocation5 + $0x38] sm:$0xff] }
 0x186   : > { %v815_v5 = vpop.permute.xlu0 %814 }
 0x187   : > { %827 = vst.msk [vmem:[#allocation5] sm:$0xff] %vm826_vm5, %v815_v5 }
 0x18a   : > { %v848_v6 = vpop.permute.xlu0 %847 }
 0x18b   : > { %860 = vst.msk [vmem:[#allocation5] sm:$0xff] %vm859_vm6, %v848_v6 }
 0x18e   : > { %v881_v7 = vpop.permute.xlu1 %880 }
 0x18f   : > { %893 = vst.msk [vmem:[#allocation5] sm:$0xff] %vm892_vm7, %v881_v7  ;;  %v947_v8 = vpop.permute.xlu0 %946 }
 0x192   : > { %v914_v9 = vpop.permute.xlu1 %913 }
 0x193   : > { %926 = vst.msk [vmem:[#allocation5] sm:$0xff] %vm925_vm8, %v914_v9 }
 0x194   : > { %959 = vst.msk [vmem:[#allocation5] sm:$0xff] %vm958_vm9, %v947_v8 }
 0x196   : > { %v981_v10 = vpop.permute.xlu1 %980 }
 0x197   : > { %v1014_v11 = vpop.permute.xlu0 %1013  ;;  %993 = vst.msk [vmem:[#allocation5] sm:$0xff] %vm992_vm10, %v981_v10 }
 0x198   : > { %1026 = vst.msk [vmem:[#allocation5] sm:$0xff] %vm1025_vm11, %v1014_v11 }
 0x19a   : > { %v817_v12 = vpop.permute.xlu1 %816 }
 0x19b   : > { %v850_v13 = vpop.permute.xlu0 %849  ;;  %828 = vst.msk [vmem:[#allocation5 + $0x10] sm:$0xff] %vm826_vm5, %v817_v12 }
 0x19c   : > { %861 = vst.msk [vmem:[#allocation5 + $0x10] sm:$0xff] %vm859_vm6, %v850_v13 }
 0x19e   : > { %v883_v14 = vpop.permute.xlu1 %882 }
 0x19f   : > { %v916_v15 = vpop.permute.xlu0 %915  ;;  %894 = vst.msk [vmem:[#allocation5 + $0x10] sm:$0xff] %vm892_vm7, %v883_v14  ;;  %v1046_v16 = vld [vmem:[#allocation5] sm:$0xff] }
 0x1a0   : > { %927 = vst.msk [vmem:[#allocation5 + $0x10] sm:$0xff] %vm925_vm8, %v916_v15  ;;  %1178 = vmatmul.mubr.bf16.vlgmr.msra.gmra.mrb[0].mxu1 %v1046_v16 }
 0x1a1   : > { %1385 = vmatprep.mubr.msk.bf16.mxu1 %vm609_vm2, %v1049_v17 }
 0x1a2   : > { %v949_v18 = vpop.permute.xlu1 %948 }
 0x1a3   : > { %960 = vst.msk [vmem:[#allocation5 + $0x10] sm:$0xff] %vm958_vm9, %v949_v18 }
 0x1a6   : > { %v1016_v19 = vpop.permute.xlu1 %1015 }
 0x1a7   : > { %v983_v20 = vpop.permute.xlu0 %982 }
 0x1a8   : > { %994 = vst.msk [vmem:[#allocation5 + $0x10] sm:$0xff] %vm992_vm10, %v983_v20 }
 0x1a9   : > { %1027 = vst.msk [vmem:[#allocation5 + $0x10] sm:$0xff] %vm1025_vm11, %v1016_v19 }
 0x1aa   : > { %v852_v25 = vpop.permute.xlu1 %851 }
 0x1ab   : > { %v819_v21 = vpop.permute.xlu0 %818 }
 0x1ac   : > { %829 = vst.msk [vmem:[#allocation5 + $0x20] sm:$0xff] %vm826_vm5, %v819_v21 }
 0x1ad   : > { %862 = vst.msk [vmem:[#allocation5 + $0x20] sm:$0xff] %vm859_vm6, %v852_v25 }
 0x1ae   : > { %v918_v23 = vpop.permute.xlu1 %917 }
 0x1af   : > { %v885_v24 = vpop.permute.xlu0 %884 }
 0x1b0   : > { %895 = vst.msk [vmem:[#allocation5 + $0x20] sm:$0xff] %vm892_vm7, %v885_v24  ;;  %v1048_v26 = vld [vmem:[#allocation5 + $0x10] sm:$0xff] }
 0x1b1   : > { %928 = vst.msk [vmem:[#allocation5 + $0x20] sm:$0xff] %vm925_vm8, %v918_v23  ;;  %1186 = vmatmul.mubr.bf16.gmra.mrb[4].mxu1 %v1048_v26 }
 0x1b2   : > { %1386 = vmatprep.mubr.msk.bf16.mxu1 %vm609_vm2, %v1051_v27 }
 0x1b3   : > { %v951_v28 = vpop.permute.xlu0 %950 }
 0x1b4   : > { %961 = vst.msk [vmem:[#allocation5 + $0x20] sm:$0xff] %vm958_vm9, %v951_v28 }
 0x1b7   : > { %v985_v29 = vpop.permute.xlu1 %984 }
 0x1b8   : > { %v1018_v30 = vpop.permute.xlu0 %1017  ;;  %995 = vst.msk [vmem:[#allocation5 + $0x20] sm:$0xff] %vm992_vm10, %v985_v29 }
 0x1b9   : > { %1028 = vst.msk [vmem:[#allocation5 + $0x20] sm:$0xff] %vm1025_vm11, %v1018_v30 }
 0x1bb   : > { %v821_v31 = vpop.permute.xlu1 %820 }
 0x1bc   : > { %v854_v22 = vpop.permute.xlu0 %853  ;;  %830 = vst.msk [vmem:[#allocation5 + $0x30] sm:$0xff] %vm826_vm5, %v821_v31 }
 0x1bd   : > { %863 = vst.msk [vmem:[#allocation5 + $0x30] sm:$0xff] %vm859_vm6, %v854_v22 }
 0x1bf   : > { %v887_v32 = vpop.permute.xlu1 %886 }
 0x1c0   : > { %v920_v33 = vpop.permute.xlu0 %919  ;;  %896 = vst.msk [vmem:[#allocation5 + $0x30] sm:$0xff] %vm892_vm7, %v887_v32  ;;  %v1050_v34 = vld [vmem:[#allocation5 + $0x20] sm:$0xff] }
 0x1c1   : > { %929 = vst.msk [vmem:[#allocation5 + $0x30] sm:$0xff] %vm925_vm8, %v920_v33  ;;  %1194 = vmatmul.mubr.bf16.gmra.mrb[8].mxu1 %v1050_v34 }
 0x1c2   : > { %1387 = vmatprep.mubr.msk.bf16.mxu1 %vm609_vm2, %v1053_v35 }
 0x1c3   : > { %v953_v36 = vpop.permute.xlu1 %952 }
 0x1c4   : > { %v987_v37 = vpop.permute.xlu0 %986  ;;  %962 = vst.msk [vmem:[#allocation5 + $0x30] sm:$0xff] %vm958_vm9, %v953_v36 }
 0x1c5   : > { %996 = vst.msk [vmem:[#allocation5 + $0x30] sm:$0xff] %vm992_vm10, %v987_v37 }
 0x1c7   : > { %v1020_v38 = vpop.permute.xlu1 %1019 }
 0x1c8   : > { %1029 = vst.msk [vmem:[#allocation5 + $0x30] sm:$0xff] %vm1025_vm11, %v1020_v38 }
 0x1cf   : > { %v1052_v39 = vld [vmem:[#allocation5 + $0x30] sm:$0xff] }
 0x1d0   : > { %1202 = vmatmul.mubr.bf16.gmra.mrb[12].mxu1 %v1052_v39 }
 0x273   : > { %v1179_v41 = vpop.f32.mrb[0].mxu1 }
 0x274   : > { %v1180_v42 = vadd.f32 %v1374_v40, %v1179_v41  ;;  %v1181_v43 = vpop.f32.mrb[1].mxu1 }
 0x275   : > { %v1182_v44 = vpop.f32.mrb[2].mxu1 }
 0x276   : > { %v1210_v45 = vmax.f32 %v1180_v42, 0.0  ;;  %v1183_v46 = vadd.f32 %v1374_v40, %v1182_v44  ;;  %v1184_v47 = vpop.f32.mrb[3].mxu1 }
 0x278   : > { %1219 = vst.msk [vmem:[#allocation6] sm:$0xff] %vm1218_vm12, %v1210_v45  ;;  %v1211_v48 = vmax.f32 %v1183_v46, 0.0 }
 0x27a   : > { %1220 = vst.msk [vmem:[#allocation6 + $0x8] sm:$0xff] %vm1218_vm12, %v1211_v48 }
 0x27f   : > { %v1227_v49 = vld [vmem:[#allocation6] sm:$0xff] }
 0x281   : > { %v1232_v50 = vld [vmem:[#allocation6 + $0x8] sm:$0xff] }
 0x282   : > { %v1236_v51 = vmax.f32 %v1227_v49, %v1232_v50 }
 0x284   : > { %v1187_v52 = vpop.f32.mrb[4].mxu1  ;;  %1240 = vst.msk [vmem:[#allocation7] sm:$0xff] %vm1218_vm12, %v1236_v51 }
 0x285   : > { %v1188_v53 = vadd.f32 %v1374_v40, %v1187_v52  ;;  %v1189_v54 = vpop.f32.mrb[5].mxu1 }
 0x286   : > { %v1190_v55 = vpop.f32.mrb[6].mxu1 }
 0x287   : > { %v1212_v56 = vmax.f32 %v1188_v53, 0.0  ;;  %v1191_v57 = vadd.f32 %v1374_v40, %v1190_v55  ;;  %v1192_v58 = vpop.f32.mrb[7].mxu1 }
 0x289   : > { %1221 = vst.msk [vmem:[#allocation6 + $0x10] sm:$0xff] %vm1218_vm12, %v1212_v56  ;;  %v1213_v59 = vmax.f32 %v1191_v57, 0.0 }
 0x28b   : > { %1222 = vst.msk [vmem:[#allocation6 + $0x18] sm:$0xff] %vm1218_vm12, %v1213_v59 }
 0x290   : > { %v1228_v60 = vld [vmem:[#allocation6 + $0x10] sm:$0xff] }
 0x292   : > { %v1233_v61 = vld [vmem:[#allocation6 + $0x18] sm:$0xff] }
 0x293   : > { %v1237_v62 = vmax.f32 %v1228_v60, %v1233_v61 }
 0x294   : > { %v1195_v63 = vpop.f32.mrb[8].mxu1 }
 0x295   : > { %1241 = vst.msk [vmem:[#allocation7 + $0x8] sm:$0xff] %vm1218_vm12, %v1237_v62  ;;  %v1196_v0 = vadd.f32 %v1374_v40, %v1195_v63  ;;  %v1197_v1 = vpop.f32.mrb[9].mxu1 }
 0x296   : > { %v1198_v2 = vpop.f32.mrb[10].mxu1 }
 0x297   : > { %v1214_v3 = vmax.f32 %v1196_v0, 0.0  ;;  %v1199_v4 = vadd.f32 %v1374_v40, %v1198_v2  ;;  %v1200_v5 = vpop.f32.mrb[11].mxu1 }
 0x299   : > { %1223 = vst.msk [vmem:[#allocation6 + $0x20] sm:$0xff] %vm1218_vm12, %v1214_v3  ;;  %v1215_v6 = vmax.f32 %v1199_v4, 0.0 }
 0x29b   : > { %1224 = vst.msk [vmem:[#allocation6 + $0x28] sm:$0xff] %vm1218_vm12, %v1215_v6 }
 0x29c   : > { %v1244_v7 = vld [vmem:[#allocation7] ss:$2 sm:$0xff]  ;;  %v1248_v8 = vld [vmem:[#allocation7 + $0x1] ss:$2 sm:$0xff] }
 0x29d   : > { %v1251_v9 = vmax.f32 %v1244_v7, %v1248_v8 }
 0x29f   : > { %1253 = vst.msk [vmem:[%s217_s15] sm:$0xff] %vm1218_vm12, %v1251_v9 }
 0x2a0   : > { %v1229_v10 = vld [vmem:[#allocation6 + $0x20] sm:$0xff] }
 0x2a2   : > { %v1234_v11 = vld [vmem:[#allocation6 + $0x28] sm:$0xff] }
 0x2a3   : > { %v1238_v12 = vmax.f32 %v1229_v10, %v1234_v11  ;;  %v1203_v13 = vpop.f32.mrb[12].mxu1 }
 0x2a4   : > { %v1204_v14 = vadd.f32 %v1374_v40, %v1203_v13  ;;  %v1205_v15 = vpop.f32.mrb[13].mxu1 }
 0x2a5   : > { %1242 = vst.msk [vmem:[#allocation7 + $0x10] sm:$0xff] %vm1218_vm12, %v1238_v12  ;;  %v1206_v16 = vpop.f32.mrb[14].mxu1 }
 0x2a6   : > { %v1216_v17 = vmax.f32 %v1204_v14, 0.0  ;;  %v1207_v18 = vadd.f32 %v1374_v40, %v1206_v16  ;;  %v1208_v19 = vpop.f32.mrb[15].mxu1 }
 0x2a8   : > { %1225 = vst.msk [vmem:[#allocation6 + $0x30] sm:$0xff] %vm1218_vm12, %v1216_v17  ;;  %v1217_v20 = vmax.f32 %v1207_v18, 0.0 }
 0x2aa   : > { %1226 = vst.msk [vmem:[#allocation6 + $0x38] sm:$0xff] %vm1218_vm12, %v1217_v20 }
 0x2af   : > { %v1230_v25 = vld [vmem:[#allocation6 + $0x30] sm:$0xff] }
 0x2b1   : > { %v1235_v21 = vld [vmem:[#allocation6 + $0x38] sm:$0xff] }
 0x2b2   : > { %v1239_v23 = vmax.f32 %v1230_v25, %v1235_v21 }
 0x2b4   : > { %1243 = vst.msk [vmem:[#allocation7 + $0x18] sm:$0xff] %vm1218_vm12, %v1239_v23 }
 0x2bb   : > { %v1246_v24 = vld [vmem:[#allocation7 + $0x10] ss:$2 sm:$0xff]  ;;  %v1250_v26 = vld [vmem:[#allocation7 + $0x11] ss:$2 sm:$0xff] }
 0x2bc   : > { %v1252_v27 = vmax.f32 %v1246_v24, %v1250_v26 }
 0x2be   : > { %1254 = vst.msk [vmem:[%s217_s15 + $0x8] sm:$0xff] %vm1218_vm12, %v1252_v27 }
 0x2bf   : > { %1544 = shalt.err (!%p1541_p3)
}
 0x2c0   : > { %s1545_s9 = scalar_lea.hbm %s1987_s26, 256  ;;  %s1549_s12 = scalar_lea.hbm %s2040_s5, 512 }
 0x2c1   : > { %p1546_p4 = scmp.ne.s32.totalorder %s1987_s26, %s1545_s9  ;;  %p1550_p9 = scmp.lt.u32.totalorder %s1987_s26, %s2040_s5 }
 0x2c2   : > { %p1551_p10 = scmp.lt.u32.totalorder %s1549_s12, %s1545_s9  ;;  %p1553_p12 = scmp.lt.u32.totalorder %s1545_s9, %s1987_s26 }
 0x2c3   : > { %p1547_p7 = pnand %p1546_p4, %p1675_p5 }
 0x2c4   : > { %p1552_p11 = por %p1551_p10, %p1550_p9 }
 0x2c5   : > { %p1548_p8 = pneg %p1547_p7 }
 0x2c6   : > { %p1554_p13 = por %p1553_p12, %p1552_p11 }
 0x2c8   : > { %p1555_p0 = pnand %p1554_p13, %p1548_p8 }
 0x2ca   : > { %1558 = shalt.err (!%p1555_p0)
}
 0x2cb   : > { %s1605_s15 = smov 128   ;;  %s1606_s16 = smov 8  }
 0x2cc   : > { %1453 = dma.vmem_to_hbm [thread:$0]  (%p1675_p5), %s1989_s17, 256, %s1987_s26, %s1994_s30, %s1605_s15, %s1605_s15, %s1606_s16  }
 0x2cd PF: > { %p1459_p1 = scmp.ge.s32.totalorder %s1593_s21, 2  ;;  %s1284_s23 = sand.u32 1, %s1581_s18  }
 0x2ce   : > { %s1285_s25 = scalar_lea.sflag [#allocation9], %s1284_s23 }
 0x2cf   : > { %p1456_p2 = pnand %p1459_p1, %p1679_p6 }
 0x2d1   : > { %1576 = dma.done.wait (!%p1456_p2), %s1285_s25, 256  }
 0x2d2   : > { %1578 = vsyncadd (!%p1456_p2), %s1285_s25, 4294967040  ;;  %p15_p3 = scmp.ge.s32.totalorder %s1662_s24, 4   ;;  %s2043_s18 = smov %s1585_s19 }
 0x2d3   : > { %s2044_s19 = smov %s1589_s20  ;;  %s2045_s20 = smov %s1673_s27 }
 0x2d4   : > { %s2046_s21 = smov %s1662_s24  ;;  %17 = sbr.rel (!%p15_p3) target bundleno = 3 (0x3), region = 98 }
 0x2db   :  { %1290 = vsyncpa [#allocation9], 1 }
 0x2dc   :  { %1292 = vsyncpa [#allocation9 + $0x1], 1 }

</bundles_post_ra>
